<compile_context>
chip_gen: v5e
topology: v5e:2x2
jax: 0.10.0
libtpu: 0.0.40
codegen_flags: <defaults>
</compile_context>

<pallas_src>
import math
import jax
import jax.numpy as jnp
from jax.experimental import pallas as pl
from jax.experimental.pallas import tpu as pltpu

# ---- "args" of the PyTorch module (small, forward-consistent sizes) ----
D_E = 32          # args.d_e
D_Q = 8           # args.d_q
NUM_HEADS = 4     # args.num_heads
D_H = 64          # args.d_h
NUM_LAYERS = 2    # args.num_layers
LN_EPS = 1e-5     # nn.LayerNorm default

_HDQ = NUM_HEADS * D_Q

_PARAM_NAMES = ("wqkv", "bqkv", "wmix", "bmix", "ln1_g", "ln1_b",
                "w1", "b1", "w2", "b2", "ln2_g", "ln2_b")


def _layernorm(x, gamma, beta):
    # LayerNorm over the last dim, biased variance, eps=1e-5 (PyTorch default).
    mean = jnp.mean(x, axis=-1, keepdims=True)
    var = jnp.mean((x - mean) ** 2, axis=-1, keepdims=True)
    return (x - mean) * jax.lax.rsqrt(var + LN_EPS) * gamma + beta


def encoder_kernel(x_ref, mask_ref,
                   wqkv_ref, bqkv_ref, wmix_ref, bmix_ref,
                   ln1_g_ref, ln1_b_ref,
                   w1_ref, b1_ref, w2_ref, b2_ref,
                   ln2_g_ref, ln2_b_ref,
                   out_ref):
    B, S, _ = mask_ref.shape              # static
    mask_add = mask_ref[...]              # (B, S, S) f32, 0 / -1e9 (additive)
    x = x_ref[...]                        # (B*S, E) f32, lane-dense

    scale = jnp.float32(1.0 / math.sqrt(D_Q))

    # Static unrolled loop over encoder layers (params stacked on axis 0).
    for l in range(NUM_LAYERS):
        # --- MultiHeadAttn: fused QKV projection (x @ W + b) ---
        qkv = jnp.dot(x, wqkv_ref[l],
                      preferred_element_type=jnp.float32) + bqkv_ref[l]  # (B*S, 3*H*dq)
        q = qkv[:, :_HDQ] * scale          # fold 1/sqrt(dq) into q once
        k = qkv[:, _HDQ:2 * _HDQ]
        v = qkv[:, 2 * _HDQ:]
        q3 = q.reshape(B, S, _HDQ)
        k3 = k.reshape(B, S, _HDQ)
        v3 = v.reshape(B, S, _HDQ)

        # --- per-head scores / softmax / context (static 4-iter loop) ---
        ctx_heads = []
        for h in range(NUM_HEADS):
            lo = h * D_Q
            q_h = q3[:, :, lo:lo + D_Q]    # (B, S, dq)
            k_h = k3[:, :, lo:lo + D_Q]
            v_h = v3[:, :, lo:lo + D_Q]

            s = jnp.einsum('bqd,bkd->bqk', q_h, k_h,
                           preferred_element_type=jnp.float32)           # (B, S, S)
            s = s + mask_add                                             # additive mask
            s = s - jnp.max(s, axis=-1, keepdims=True)
            p = jnp.exp(s)
            inv = pl.reciprocal(jnp.sum(p, axis=-1, keepdims=True), approx=True)
            p = p * inv
            ctx_heads.append(jnp.einsum('bqk,bkd->bqd', p, v_h,
                                        preferred_element_type=jnp.float32))

        # Concatenate heads (head-major, matching PyTorch .view layout) and
        # apply the mixing Linear with ONE matmul.
        ctx = jnp.concatenate(ctx_heads, axis=-1).reshape(B * S, _HDQ)
        mixed = jnp.dot(ctx, wmix_ref[l],
                        preferred_element_type=jnp.float32) + bmix_ref[l]
        y = _layernorm(x + mixed, ln1_g_ref[l], ln1_b_ref[l])

        # --- PosiFeedForward: Conv1d(k=1) -> ReLU -> Conv1d(k=1) == 2 Linears ---
        h1 = jnp.dot(y, w1_ref[l], preferred_element_type=jnp.float32) + b1_ref[l]
        h1 = jnp.maximum(h1, 0.0)
        h2 = jnp.dot(h1, w2_ref[l], preferred_element_type=jnp.float32) + b2_ref[l]
        x = _layernorm(y + h2, ln2_g_ref[l], ln2_b_ref[l])

    out_ref[...] = x


@jax.jit
def encoder_forward(x, mask, stacked_params):
    """x: (B, S, E) f32, mask: (B, S, S) int (1 -> masked). One pallas_call total."""
    B, S, E = x.shape
    x2d = x.reshape(B * S, E)
    mask_add = mask.astype(jnp.float32) * jnp.float32(-1e9)   # additive mask, built once

    n_in = 2 + len(stacked_params)
    out2d = pl.pallas_call(
        encoder_kernel,
        out_shape=jax.ShapeDtypeStruct((B * S, E), x.dtype),
        in_specs=[pl.BlockSpec(memory_space=pltpu.MemorySpace.VMEM)] * n_in,
        out_specs=pl.BlockSpec(memory_space=pltpu.MemorySpace.VMEM),
    )(x2d, mask_add, *stacked_params)
    return out2d.reshape(B, S, E)


# ----------------------------- parameter setup -----------------------------

def _init_linear(key, out_f, in_f):
    # Deterministic init mimicking nn.Linear/Conv1d U(-1/sqrt(fan_in), 1/sqrt(fan_in)).
    bound = 1.0 / math.sqrt(in_f)
    kw, kb = jax.random.split(key)
    w = jax.random.uniform(kw, (out_f, in_f), jnp.float32, -bound, bound)
    b = jax.random.uniform(kb, (out_f,), jnp.float32, -bound, bound)
    return w, b


def init_layer_params(key):
    """Returns kernel-friendly params: weights pre-transposed to (in, out),
    biases (1, out), Q/K/V fused into one weight/bias."""
    ks = jax.random.split(key, 6)
    wq, bq = _init_linear(ks[0], _HDQ, D_E)
    wk, bk = _init_linear(ks[1], _HDQ, D_E)
    wv, bv = _init_linear(ks[2], _HDQ, D_E)
    wmix, bmix = _init_linear(ks[3], D_E, _HDQ)
    w1, b1 = _init_linear(ks[4], D_H, D_E)   # Conv1d(d_e, d_h, 1) weight squeezed
    w2, b2 = _init_linear(ks[5], D_E, D_H)   # Conv1d(d_h, d_e, 1) weight squeezed

    wqkv = jnp.concatenate([wq.T, wk.T, wv.T], axis=1)   # (E, 3*H*dq)
    bqkv = jnp.concatenate([bq, bk, bv])[None, :]        # (1, 3*H*dq)

    return {
        "wqkv": wqkv, "bqkv": bqkv,
        "wmix": wmix.T, "bmix": bmix[None, :],
        "ln1_g": jnp.ones((1, D_E), jnp.float32),
        "ln1_b": jnp.zeros((1, D_E), jnp.float32),
        "w1": w1.T, "b1": b1[None, :],
        "w2": w2.T, "b2": b2[None, :],
        "ln2_g": jnp.ones((1, D_E), jnp.float32),
        "ln2_b": jnp.zeros((1, D_E), jnp.float32),
    }


def stack_layer_params(per_layer):
    """Stack each named param across layers along a leading (layer) axis."""
    return [jnp.stack([p[name] for p in per_layer], axis=0) for name in _PARAM_NAMES]


if __name__ == "__main__":
    B, S = 2, 8
    key = jax.random.PRNGKey(0)
    k_x, k_p = jax.random.split(key)

    x = jax.random.normal(k_x, (B, S, D_E), jnp.float32)

    # Padding-style mask: batch 0 sees all 8 keys, batch 1 only the first 6.
    valid_lens = jnp.array([8, 6], dtype=jnp.int32)
    mask = (jnp.arange(S, dtype=jnp.int32)[None, None, :]
            >= valid_lens[:, None, None]).astype(jnp.int32)          # (B, 1, S)
    mask = jnp.broadcast_to(mask, (B, S, S))                          # (B, S, S)

    layer_keys = jax.random.split(k_p, NUM_LAYERS)
    stacked = stack_layer_params([init_layer_params(k) for k in layer_keys])

    out = encoder_forward(x, mask, stacked)
    jax.block_until_ready(out)
    assert out.shape == (B, S, D_E) and out.dtype == jnp.float32
    print("KERNEL_OK")
</pallas_src>

<mosaic_0001>
module attributes {stable_mosaic.version = 11 : i64} {
  func.func @encoder_kernel(%arg0: memref<16x32xf32, #tpu.memory_space<vmem>>, %arg1: memref<2x8x8xf32, #tpu.memory_space<vmem>>, %arg2: memref<2x32x96xf32, #tpu.memory_space<vmem>>, %arg3: memref<2x1x96xf32, #tpu.memory_space<vmem>>, %arg4: memref<2x32x32xf32, #tpu.memory_space<vmem>>, %arg5: memref<2x1x32xf32, #tpu.memory_space<vmem>>, %arg6: memref<2x1x32xf32, #tpu.memory_space<vmem>>, %arg7: memref<2x1x32xf32, #tpu.memory_space<vmem>>, %arg8: memref<2x32x64xf32, #tpu.memory_space<vmem>>, %arg9: memref<2x1x64xf32, #tpu.memory_space<vmem>>, %arg10: memref<2x64x32xf32, #tpu.memory_space<vmem>>, %arg11: memref<2x1x32xf32, #tpu.memory_space<vmem>>, %arg12: memref<2x1x32xf32, #tpu.memory_space<vmem>>, %arg13: memref<2x1x32xf32, #tpu.memory_space<vmem>>, %arg14: memref<16x32xf32, #tpu.memory_space<vmem>>) attributes {dimension_semantics = [], scalar_prefetch = 0 : i64, scratch_operands = 0 : i64, tpu.core_type = #tpu.core_type<tc>} {
    %c0 = arith.constant 0 : index
    %c0_0 = arith.constant 0 : index
    %c0_1 = arith.constant 0 : index
    %0 = vector.load %arg1[%c0, %c0_0, %c0_1] : memref<2x8x8xf32, #tpu.memory_space<vmem>>, vector<2x8x8xf32>
    %c0_2 = arith.constant 0 : index
    %c0_3 = arith.constant 0 : index
    %1 = vector.load %arg0[%c0_2, %c0_3] : memref<16x32xf32, #tpu.memory_space<vmem>>, vector<16x32xf32>
    %c0_4 = arith.constant 0 : index
    %c0_5 = arith.constant 0 : index
    %c0_6 = arith.constant 0 : index
    %2 = vector.load %arg2[%c0_4, %c0_5, %c0_6] : memref<2x32x96xf32, #tpu.memory_space<vmem>>, vector<1x32x96xf32>
    %3 = vector.shape_cast %2 : vector<1x32x96xf32> to vector<32x96xf32>
    %cst = arith.constant dense<0.000000e+00> : vector<16x96xf32>
    %4 = tpu.matmul %1, %3, %cst {dimension_numbers = #tpu.dot_dimension_numbers<[1], [0], [0], [1], [0, 0, 1, 1], [], []>} : vector<16x32xf32>, vector<32x96xf32>, vector<16x96xf32> -> vector<16x96xf32>
    %c0_7 = arith.constant 0 : index
    %c0_8 = arith.constant 0 : index
    %c0_9 = arith.constant 0 : index
    %5 = vector.load %arg3[%c0_7, %c0_8, %c0_9] : memref<2x1x96xf32, #tpu.memory_space<vmem>>, vector<1x1x96xf32>
    %6 = vector.shape_cast %5 : vector<1x1x96xf32> to vector<1x96xf32>
    %7 = vector.broadcast %6 : vector<1x96xf32> to vector<16x96xf32>
    %8 = arith.addf %4, %7 : vector<16x96xf32>
    %9 = vector.extract_strided_slice %8 {offsets = [0, 0], sizes = [16, 32], strides = [1, 1]} : vector<16x96xf32> to vector<16x32xf32>
    %cst_10 = arith.constant 0.353553385 : f32
    %10 = vector.broadcast %cst_10 : f32 to vector<16x32xf32>
    %11 = arith.mulf %9, %10 : vector<16x32xf32>
    %12 = vector.extract_strided_slice %8 {offsets = [0, 32], sizes = [16, 32], strides = [1, 1]} : vector<16x96xf32> to vector<16x32xf32>
    %13 = vector.extract_strided_slice %8 {offsets = [0, 64], sizes = [16, 32], strides = [1, 1]} : vector<16x96xf32> to vector<16x32xf32>
    %14 = vector.shape_cast %11 : vector<16x32xf32> to vector<2x8x32xf32>
    %15 = vector.shape_cast %12 : vector<16x32xf32> to vector<2x8x32xf32>
    %16 = vector.shape_cast %13 : vector<16x32xf32> to vector<2x8x32xf32>
    %17 = vector.extract_strided_slice %14 {offsets = [0, 0, 0], sizes = [2, 8, 8], strides = [1, 1, 1]} : vector<2x8x32xf32> to vector<2x8x8xf32>
    %18 = vector.extract_strided_slice %15 {offsets = [0, 0, 0], sizes = [2, 8, 8], strides = [1, 1, 1]} : vector<2x8x32xf32> to vector<2x8x8xf32>
    %19 = vector.extract_strided_slice %16 {offsets = [0, 0, 0], sizes = [2, 8, 8], strides = [1, 1, 1]} : vector<2x8x32xf32> to vector<2x8x8xf32>
    "tpu.trace_start"() <{level = 10 : i32, message = "bqd,bkd->bqk"}> : () -> ()
    %cst_11 = arith.constant dense<0.000000e+00> : vector<2x8x8xf32>
    %20 = tpu.matmul %17, %18, %cst_11 {dimension_numbers = #tpu.dot_dimension_numbers<[2], [2], [1], [1], [0, 0, 0, 1, 1, 1], [0], [0]>} : vector<2x8x8xf32>, vector<2x8x8xf32>, vector<2x8x8xf32> -> vector<2x8x8xf32>
    "tpu.trace_stop"() : () -> ()
    %21 = arith.addf %20, %0 : vector<2x8x8xf32>
    %cst_12 = arith.constant dense<0xFF800000> : vector<2x8xf32>
    %22 = vector.multi_reduction <maximumf>, %21, %cst_12 [2] : vector<2x8x8xf32> to vector<2x8xf32>
    %23 = vector.shape_cast %22 : vector<2x8xf32> to vector<2x8x1xf32>
    %24 = vector.broadcast %23 : vector<2x8x1xf32> to vector<2x8x8xf32>
    %25 = arith.subf %21, %24 : vector<2x8x8xf32>
    %26 = math.exp %25 : vector<2x8x8xf32>
    %cst_13 = arith.constant dense<0.000000e+00> : vector<2x8xf32>
    %27 = vector.multi_reduction <add>, %26, %cst_13 [2] : vector<2x8x8xf32> to vector<2x8xf32>
    %28 = vector.shape_cast %27 : vector<2x8xf32> to vector<2x8x1xf32>
    %29 = tpu.reciprocal %28 {approx = true} : vector<2x8x1xf32> -> vector<2x8x1xf32>
    %30 = vector.broadcast %29 : vector<2x8x1xf32> to vector<2x8x8xf32>
    %31 = arith.mulf %26, %30 : vector<2x8x8xf32>
    "tpu.trace_start"() <{level = 10 : i32, message = "bqk,bkd->bqd"}> : () -> ()
    %cst_14 = arith.constant dense<0.000000e+00> : vector<2x8x8xf32>
    %32 = tpu.matmul %31, %19, %cst_14 {dimension_numbers = #tpu.dot_dimension_numbers<[2], [1], [1], [2], [0, 0, 0, 1, 1, 2], [0], [0]>} : vector<2x8x8xf32>, vector<2x8x8xf32>, vector<2x8x8xf32> -> vector<2x8x8xf32>
    "tpu.trace_stop"() : () -> ()
    %33 = vector.extract_strided_slice %14 {offsets = [0, 0, 8], sizes = [2, 8, 8], strides = [1, 1, 1]} : vector<2x8x32xf32> to vector<2x8x8xf32>
    %34 = vector.extract_strided_slice %15 {offsets = [0, 0, 8], sizes = [2, 8, 8], strides = [1, 1, 1]} : vector<2x8x32xf32> to vector<2x8x8xf32>
    %35 = vector.extract_strided_slice %16 {offsets = [0, 0, 8], sizes = [2, 8, 8], strides = [1, 1, 1]} : vector<2x8x32xf32> to vector<2x8x8xf32>
    "tpu.trace_start"() <{level = 10 : i32, message = "bqd,bkd->bqk"}> : () -> ()
    %cst_15 = arith.constant dense<0.000000e+00> : vector<2x8x8xf32>
    %36 = tpu.matmul %33, %34, %cst_15 {dimension_numbers = #tpu.dot_dimension_numbers<[2], [2], [1], [1], [0, 0, 0, 1, 1, 1], [0], [0]>} : vector<2x8x8xf32>, vector<2x8x8xf32>, vector<2x8x8xf32> -> vector<2x8x8xf32>
    "tpu.trace_stop"() : () -> ()
    %37 = arith.addf %36, %0 : vector<2x8x8xf32>
    %cst_16 = arith.constant dense<0xFF800000> : vector<2x8xf32>
    %38 = vector.multi_reduction <maximumf>, %37, %cst_16 [2] : vector<2x8x8xf32> to vector<2x8xf32>
    %39 = vector.shape_cast %38 : vector<2x8xf32> to vector<2x8x1xf32>
    %40 = vector.broadcast %39 : vector<2x8x1xf32> to vector<2x8x8xf32>
    %41 = arith.subf %37, %40 : vector<2x8x8xf32>
    %42 = math.exp %41 : vector<2x8x8xf32>
    %cst_17 = arith.constant dense<0.000000e+00> : vector<2x8xf32>
    %43 = vector.multi_reduction <add>, %42, %cst_17 [2] : vector<2x8x8xf32> to vector<2x8xf32>
    %44 = vector.shape_cast %43 : vector<2x8xf32> to vector<2x8x1xf32>
    %45 = tpu.reciprocal %44 {approx = true} : vector<2x8x1xf32> -> vector<2x8x1xf32>
    %46 = vector.broadcast %45 : vector<2x8x1xf32> to vector<2x8x8xf32>
    %47 = arith.mulf %42, %46 : vector<2x8x8xf32>
    "tpu.trace_start"() <{level = 10 : i32, message = "bqk,bkd->bqd"}> : () -> ()
    %cst_18 = arith.constant dense<0.000000e+00> : vector<2x8x8xf32>
    %48 = tpu.matmul %47, %35, %cst_18 {dimension_numbers = #tpu.dot_dimension_numbers<[2], [1], [1], [2], [0, 0, 0, 1, 1, 2], [0], [0]>} : vector<2x8x8xf32>, vector<2x8x8xf32>, vector<2x8x8xf32> -> vector<2x8x8xf32>
    "tpu.trace_stop"() : () -> ()
    %49 = vector.extract_strided_slice %14 {offsets = [0, 0, 16], sizes = [2, 8, 8], strides = [1, 1, 1]} : vector<2x8x32xf32> to vector<2x8x8xf32>
    %50 = vector.extract_strided_slice %15 {offsets = [0, 0, 16], sizes = [2, 8, 8], strides = [1, 1, 1]} : vector<2x8x32xf32> to vector<2x8x8xf32>
    %51 = vector.extract_strided_slice %16 {offsets = [0, 0, 16], sizes = [2, 8, 8], strides = [1, 1, 1]} : vector<2x8x32xf32> to vector<2x8x8xf32>
    "tpu.trace_start"() <{level = 10 : i32, message = "bqd,bkd->bqk"}> : () -> ()
    %cst_19 = arith.constant dense<0.000000e+00> : vector<2x8x8xf32>
    %52 = tpu.matmul %49, %50, %cst_19 {dimension_numbers = #tpu.dot_dimension_numbers<[2], [2], [1], [1], [0, 0, 0, 1, 1, 1], [0], [0]>} : vector<2x8x8xf32>, vector<2x8x8xf32>, vector<2x8x8xf32> -> vector<2x8x8xf32>
    "tpu.trace_stop"() : () -> ()
    %53 = arith.addf %52, %0 : vector<2x8x8xf32>
    %cst_20 = arith.constant dense<0xFF800000> : vector<2x8xf32>
    %54 = vector.multi_reduction <maximumf>, %53, %cst_20 [2] : vector<2x8x8xf32> to vector<2x8xf32>
    %55 = vector.shape_cast %54 : vector<2x8xf32> to vector<2x8x1xf32>
    %56 = vector.broadcast %55 : vector<2x8x1xf32> to vector<2x8x8xf32>
    %57 = arith.subf %53, %56 : vector<2x8x8xf32>
    %58 = math.exp %57 : vector<2x8x8xf32>
    %cst_21 = arith.constant dense<0.000000e+00> : vector<2x8xf32>
    %59 = vector.multi_reduction <add>, %58, %cst_21 [2] : vector<2x8x8xf32> to vector<2x8xf32>
    %60 = vector.shape_cast %59 : vector<2x8xf32> to vector<2x8x1xf32>
    %61 = tpu.reciprocal %60 {approx = true} : vector<2x8x1xf32> -> vector<2x8x1xf32>
    %62 = vector.broadcast %61 : vector<2x8x1xf32> to vector<2x8x8xf32>
    %63 = arith.mulf %58, %62 : vector<2x8x8xf32>
    "tpu.trace_start"() <{level = 10 : i32, message = "bqk,bkd->bqd"}> : () -> ()
    %cst_22 = arith.constant dense<0.000000e+00> : vector<2x8x8xf32>
    %64 = tpu.matmul %63, %51, %cst_22 {dimension_numbers = #tpu.dot_dimension_numbers<[2], [1], [1], [2], [0, 0, 0, 1, 1, 2], [0], [0]>} : vector<2x8x8xf32>, vector<2x8x8xf32>, vector<2x8x8xf32> -> vector<2x8x8xf32>
    "tpu.trace_stop"() : () -> ()
    %65 = vector.extract_strided_slice %14 {offsets = [0, 0, 24], sizes = [2, 8, 8], strides = [1, 1, 1]} : vector<2x8x32xf32> to vector<2x8x8xf32>
    %66 = vector.extract_strided_slice %15 {offsets = [0, 0, 24], sizes = [2, 8, 8], strides = [1, 1, 1]} : vector<2x8x32xf32> to vector<2x8x8xf32>
    %67 = vector.extract_strided_slice %16 {offsets = [0, 0, 24], sizes = [2, 8, 8], strides = [1, 1, 1]} : vector<2x8x32xf32> to vector<2x8x8xf32>
    "tpu.trace_start"() <{level = 10 : i32, message = "bqd,bkd->bqk"}> : () -> ()
    %cst_23 = arith.constant dense<0.000000e+00> : vector<2x8x8xf32>
    %68 = tpu.matmul %65, %66, %cst_23 {dimension_numbers = #tpu.dot_dimension_numbers<[2], [2], [1], [1], [0, 0, 0, 1, 1, 1], [0], [0]>} : vector<2x8x8xf32>, vector<2x8x8xf32>, vector<2x8x8xf32> -> vector<2x8x8xf32>
    "tpu.trace_stop"() : () -> ()
    %69 = arith.addf %68, %0 : vector<2x8x8xf32>
    %cst_24 = arith.constant dense<0xFF800000> : vector<2x8xf32>
    %70 = vector.multi_reduction <maximumf>, %69, %cst_24 [2] : vector<2x8x8xf32> to vector<2x8xf32>
    %71 = vector.shape_cast %70 : vector<2x8xf32> to vector<2x8x1xf32>
    %72 = vector.broadcast %71 : vector<2x8x1xf32> to vector<2x8x8xf32>
    %73 = arith.subf %69, %72 : vector<2x8x8xf32>
    %74 = math.exp %73 : vector<2x8x8xf32>
    %cst_25 = arith.constant dense<0.000000e+00> : vector<2x8xf32>
    %75 = vector.multi_reduction <add>, %74, %cst_25 [2] : vector<2x8x8xf32> to vector<2x8xf32>
    %76 = vector.shape_cast %75 : vector<2x8xf32> to vector<2x8x1xf32>
    %77 = tpu.reciprocal %76 {approx = true} : vector<2x8x1xf32> -> vector<2x8x1xf32>
    %78 = vector.broadcast %77 : vector<2x8x1xf32> to vector<2x8x8xf32>
    %79 = arith.mulf %74, %78 : vector<2x8x8xf32>
    "tpu.trace_start"() <{level = 10 : i32, message = "bqk,bkd->bqd"}> : () -> ()
    %cst_26 = arith.constant dense<0.000000e+00> : vector<2x8x8xf32>
    %80 = tpu.matmul %79, %67, %cst_26 {dimension_numbers = #tpu.dot_dimension_numbers<[2], [1], [1], [2], [0, 0, 0, 1, 1, 2], [0], [0]>} : vector<2x8x8xf32>, vector<2x8x8xf32>, vector<2x8x8xf32> -> vector<2x8x8xf32>
    "tpu.trace_stop"() : () -> ()
    %81 = tpu.concatenate %32, %48, %64, %80 in 2 : vector<2x8x8xf32>, vector<2x8x8xf32>, vector<2x8x8xf32>, vector<2x8x8xf32> -> vector<2x8x32xf32>
    %82 = vector.shape_cast %81 : vector<2x8x32xf32> to vector<16x32xf32>
    %c0_27 = arith.constant 0 : index
    %c0_28 = arith.constant 0 : index
    %c0_29 = arith.constant 0 : index
    %83 = vector.load %arg4[%c0_27, %c0_28, %c0_29] : memref<2x32x32xf32, #tpu.memory_space<vmem>>, vector<1x32x32xf32>
    %84 = vector.shape_cast %83 : vector<1x32x32xf32> to vector<32x32xf32>
    %cst_30 = arith.constant dense<0.000000e+00> : vector<16x32xf32>
    %85 = tpu.matmul %82, %84, %cst_30 {dimension_numbers = #tpu.dot_dimension_numbers<[1], [0], [0], [1], [0, 0, 1, 1], [], []>} : vector<16x32xf32>, vector<32x32xf32>, vector<16x32xf32> -> vector<16x32xf32>
    %c0_31 = arith.constant 0 : index
    %c0_32 = arith.constant 0 : index
    %c0_33 = arith.constant 0 : index
    %86 = vector.load %arg5[%c0_31, %c0_32, %c0_33] : memref<2x1x32xf32, #tpu.memory_space<vmem>>, vector<1x1x32xf32>
    %87 = vector.shape_cast %86 : vector<1x1x32xf32> to vector<1x32xf32>
    %88 = vector.broadcast %87 : vector<1x32xf32> to vector<16x32xf32>
    %89 = arith.addf %85, %88 : vector<16x32xf32>
    %90 = arith.addf %1, %89 : vector<16x32xf32>
    %c0_34 = arith.constant 0 : index
    %c0_35 = arith.constant 0 : index
    %c0_36 = arith.constant 0 : index
    %91 = vector.load %arg6[%c0_34, %c0_35, %c0_36] : memref<2x1x32xf32, #tpu.memory_space<vmem>>, vector<1x1x32xf32>
    %92 = vector.shape_cast %91 : vector<1x1x32xf32> to vector<1x32xf32>
    %c0_37 = arith.constant 0 : index
    %c0_38 = arith.constant 0 : index
    %c0_39 = arith.constant 0 : index
    %93 = vector.load %arg7[%c0_37, %c0_38, %c0_39] : memref<2x1x32xf32, #tpu.memory_space<vmem>>, vector<1x1x32xf32>
    %94 = vector.shape_cast %93 : vector<1x1x32xf32> to vector<1x32xf32>
    %cst_40 = arith.constant dense<0.000000e+00> : vector<16xf32>
    %95 = vector.multi_reduction <add>, %90, %cst_40 [1] : vector<16x32xf32> to vector<16xf32>
    %96 = vector.shape_cast %95 : vector<16xf32> to vector<16x1xf32>
    %cst_41 = arith.constant 3.200000e+01 : f32
    %97 = vector.broadcast %cst_41 : f32 to vector<16x1xf32>
    %98 = arith.divf %96, %97 : vector<16x1xf32>
    %99 = vector.broadcast %98 : vector<16x1xf32> to vector<16x32xf32>
    %100 = arith.subf %90, %99 : vector<16x32xf32>
    %101 = arith.mulf %100, %100 : vector<16x32xf32>
    %cst_42 = arith.constant dense<0.000000e+00> : vector<16xf32>
    %102 = vector.multi_reduction <add>, %101, %cst_42 [1] : vector<16x32xf32> to vector<16xf32>
    %103 = vector.shape_cast %102 : vector<16xf32> to vector<16x1xf32>
    %cst_43 = arith.constant 3.200000e+01 : f32
    %104 = vector.broadcast %cst_43 : f32 to vector<16x1xf32>
    %105 = arith.divf %103, %104 : vector<16x1xf32>
    %106 = vector.broadcast %98 : vector<16x1xf32> to vector<16x32xf32>
    %107 = arith.subf %90, %106 : vector<16x32xf32>
    %cst_44 = arith.constant 9.99999974E-6 : f32
    %108 = vector.broadcast %cst_44 : f32 to vector<16x1xf32>
    %109 = arith.addf %105, %108 : vector<16x1xf32>
    %110 = math.rsqrt %109 : vector<16x1xf32>
    %111 = vector.broadcast %110 : vector<16x1xf32> to vector<16x32xf32>
    %112 = arith.mulf %107, %111 : vector<16x32xf32>
    %113 = vector.broadcast %92 : vector<1x32xf32> to vector<16x32xf32>
    %114 = arith.mulf %112, %113 : vector<16x32xf32>
    %115 = vector.broadcast %94 : vector<1x32xf32> to vector<16x32xf32>
    %116 = arith.addf %114, %115 : vector<16x32xf32>
    %c0_45 = arith.constant 0 : index
    %c0_46 = arith.constant 0 : index
    %c0_47 = arith.constant 0 : index
    %117 = vector.load %arg8[%c0_45, %c0_46, %c0_47] : memref<2x32x64xf32, #tpu.memory_space<vmem>>, vector<1x32x64xf32>
    %118 = vector.shape_cast %117 : vector<1x32x64xf32> to vector<32x64xf32>
    %cst_48 = arith.constant dense<0.000000e+00> : vector<16x64xf32>
    %119 = tpu.matmul %116, %118, %cst_48 {dimension_numbers = #tpu.dot_dimension_numbers<[1], [0], [0], [1], [0, 0, 1, 1], [], []>} : vector<16x32xf32>, vector<32x64xf32>, vector<16x64xf32> -> vector<16x64xf32>
    %c0_49 = arith.constant 0 : index
    %c0_50 = arith.constant 0 : index
    %c0_51 = arith.constant 0 : index
    %120 = vector.load %arg9[%c0_49, %c0_50, %c0_51] : memref<2x1x64xf32, #tpu.memory_space<vmem>>, vector<1x1x64xf32>
    %121 = vector.shape_cast %120 : vector<1x1x64xf32> to vector<1x64xf32>
    %122 = vector.broadcast %121 : vector<1x64xf32> to vector<16x64xf32>
    %123 = arith.addf %119, %122 : vector<16x64xf32>
    %cst_52 = arith.constant 0.000000e+00 : f32
    %124 = vector.broadcast %cst_52 : f32 to vector<16x64xf32>
    %125 = arith.maximumf %123, %124 : vector<16x64xf32>
    %c0_53 = arith.constant 0 : index
    %c0_54 = arith.constant 0 : index
    %c0_55 = arith.constant 0 : index
    %126 = vector.load %arg10[%c0_53, %c0_54, %c0_55] : memref<2x64x32xf32, #tpu.memory_space<vmem>>, vector<1x64x32xf32>
    %127 = vector.shape_cast %126 : vector<1x64x32xf32> to vector<64x32xf32>
    %cst_56 = arith.constant dense<0.000000e+00> : vector<16x32xf32>
    %128 = tpu.matmul %125, %127, %cst_56 {dimension_numbers = #tpu.dot_dimension_numbers<[1], [0], [0], [1], [0, 0, 1, 1], [], []>} : vector<16x64xf32>, vector<64x32xf32>, vector<16x32xf32> -> vector<16x32xf32>
    %c0_57 = arith.constant 0 : index
    %c0_58 = arith.constant 0 : index
    %c0_59 = arith.constant 0 : index
    %129 = vector.load %arg11[%c0_57, %c0_58, %c0_59] : memref<2x1x32xf32, #tpu.memory_space<vmem>>, vector<1x1x32xf32>
    %130 = vector.shape_cast %129 : vector<1x1x32xf32> to vector<1x32xf32>
    %131 = vector.broadcast %130 : vector<1x32xf32> to vector<16x32xf32>
    %132 = arith.addf %128, %131 : vector<16x32xf32>
    %133 = arith.addf %116, %132 : vector<16x32xf32>
    %c0_60 = arith.constant 0 : index
    %c0_61 = arith.constant 0 : index
    %c0_62 = arith.constant 0 : index
    %134 = vector.load %arg12[%c0_60, %c0_61, %c0_62] : memref<2x1x32xf32, #tpu.memory_space<vmem>>, vector<1x1x32xf32>
    %135 = vector.shape_cast %134 : vector<1x1x32xf32> to vector<1x32xf32>
    %c0_63 = arith.constant 0 : index
    %c0_64 = arith.constant 0 : index
    %c0_65 = arith.constant 0 : index
    %136 = vector.load %arg13[%c0_63, %c0_64, %c0_65] : memref<2x1x32xf32, #tpu.memory_space<vmem>>, vector<1x1x32xf32>
    %137 = vector.shape_cast %136 : vector<1x1x32xf32> to vector<1x32xf32>
    %cst_66 = arith.constant dense<0.000000e+00> : vector<16xf32>
    %138 = vector.multi_reduction <add>, %133, %cst_66 [1] : vector<16x32xf32> to vector<16xf32>
    %139 = vector.shape_cast %138 : vector<16xf32> to vector<16x1xf32>
    %cst_67 = arith.constant 3.200000e+01 : f32
    %140 = vector.broadcast %cst_67 : f32 to vector<16x1xf32>
    %141 = arith.divf %139, %140 : vector<16x1xf32>
    %142 = vector.broadcast %141 : vector<16x1xf32> to vector<16x32xf32>
    %143 = arith.subf %133, %142 : vector<16x32xf32>
    %144 = arith.mulf %143, %143 : vector<16x32xf32>
    %cst_68 = arith.constant dense<0.000000e+00> : vector<16xf32>
    %145 = vector.multi_reduction <add>, %144, %cst_68 [1] : vector<16x32xf32> to vector<16xf32>
    %146 = vector.shape_cast %145 : vector<16xf32> to vector<16x1xf32>
    %cst_69 = arith.constant 3.200000e+01 : f32
    %147 = vector.broadcast %cst_69 : f32 to vector<16x1xf32>
    %148 = arith.divf %146, %147 : vector<16x1xf32>
    %149 = vector.broadcast %141 : vector<16x1xf32> to vector<16x32xf32>
    %150 = arith.subf %133, %149 : vector<16x32xf32>
    %cst_70 = arith.constant 9.99999974E-6 : f32
    %151 = vector.broadcast %cst_70 : f32 to vector<16x1xf32>
    %152 = arith.addf %148, %151 : vector<16x1xf32>
    %153 = math.rsqrt %152 : vector<16x1xf32>
    %154 = vector.broadcast %153 : vector<16x1xf32> to vector<16x32xf32>
    %155 = arith.mulf %150, %154 : vector<16x32xf32>
    %156 = vector.broadcast %135 : vector<1x32xf32> to vector<16x32xf32>
    %157 = arith.mulf %155, %156 : vector<16x32xf32>
    %158 = vector.broadcast %137 : vector<1x32xf32> to vector<16x32xf32>
    %159 = arith.addf %157, %158 : vector<16x32xf32>
    %c1 = arith.constant 1 : index
    %c0_71 = arith.constant 0 : index
    %c0_72 = arith.constant 0 : index
    %160 = vector.load %arg2[%c1, %c0_71, %c0_72] : memref<2x32x96xf32, #tpu.memory_space<vmem>>, vector<1x32x96xf32>
    %161 = vector.shape_cast %160 : vector<1x32x96xf32> to vector<32x96xf32>
    %cst_73 = arith.constant dense<0.000000e+00> : vector<16x96xf32>
    %162 = tpu.matmul %159, %161, %cst_73 {dimension_numbers = #tpu.dot_dimension_numbers<[1], [0], [0], [1], [0, 0, 1, 1], [], []>} : vector<16x32xf32>, vector<32x96xf32>, vector<16x96xf32> -> vector<16x96xf32>
    %c1_74 = arith.constant 1 : index
    %c0_75 = arith.constant 0 : index
    %c0_76 = arith.constant 0 : index
    %163 = vector.load %arg3[%c1_74, %c0_75, %c0_76] : memref<2x1x96xf32, #tpu.memory_space<vmem>>, vector<1x1x96xf32>
    %164 = vector.shape_cast %163 : vector<1x1x96xf32> to vector<1x96xf32>
    %165 = vector.broadcast %164 : vector<1x96xf32> to vector<16x96xf32>
    %166 = arith.addf %162, %165 : vector<16x96xf32>
    %167 = vector.extract_strided_slice %166 {offsets = [0, 0], sizes = [16, 32], strides = [1, 1]} : vector<16x96xf32> to vector<16x32xf32>
    %cst_77 = arith.constant 0.353553385 : f32
    %168 = vector.broadcast %cst_77 : f32 to vector<16x32xf32>
    %169 = arith.mulf %167, %168 : vector<16x32xf32>
    %170 = vector.extract_strided_slice %166 {offsets = [0, 32], sizes = [16, 32], strides = [1, 1]} : vector<16x96xf32> to vector<16x32xf32>
    %171 = vector.extract_strided_slice %166 {offsets = [0, 64], sizes = [16, 32], strides = [1, 1]} : vector<16x96xf32> to vector<16x32xf32>
    %172 = vector.shape_cast %169 : vector<16x32xf32> to vector<2x8x32xf32>
    %173 = vector.shape_cast %170 : vector<16x32xf32> to vector<2x8x32xf32>
    %174 = vector.shape_cast %171 : vector<16x32xf32> to vector<2x8x32xf32>
    %175 = vector.extract_strided_slice %172 {offsets = [0, 0, 0], sizes = [2, 8, 8], strides = [1, 1, 1]} : vector<2x8x32xf32> to vector<2x8x8xf32>
    %176 = vector.extract_strided_slice %173 {offsets = [0, 0, 0], sizes = [2, 8, 8], strides = [1, 1, 1]} : vector<2x8x32xf32> to vector<2x8x8xf32>
    %177 = vector.extract_strided_slice %174 {offsets = [0, 0, 0], sizes = [2, 8, 8], strides = [1, 1, 1]} : vector<2x8x32xf32> to vector<2x8x8xf32>
    "tpu.trace_start"() <{level = 10 : i32, message = "bqd,bkd->bqk"}> : () -> ()
    %cst_78 = arith.constant dense<0.000000e+00> : vector<2x8x8xf32>
    %178 = tpu.matmul %175, %176, %cst_78 {dimension_numbers = #tpu.dot_dimension_numbers<[2], [2], [1], [1], [0, 0, 0, 1, 1, 1], [0], [0]>} : vector<2x8x8xf32>, vector<2x8x8xf32>, vector<2x8x8xf32> -> vector<2x8x8xf32>
    "tpu.trace_stop"() : () -> ()
    %179 = arith.addf %178, %0 : vector<2x8x8xf32>
    %cst_79 = arith.constant dense<0xFF800000> : vector<2x8xf32>
    %180 = vector.multi_reduction <maximumf>, %179, %cst_79 [2] : vector<2x8x8xf32> to vector<2x8xf32>
    %181 = vector.shape_cast %180 : vector<2x8xf32> to vector<2x8x1xf32>
    %182 = vector.broadcast %181 : vector<2x8x1xf32> to vector<2x8x8xf32>
    %183 = arith.subf %179, %182 : vector<2x8x8xf32>
    %184 = math.exp %183 : vector<2x8x8xf32>
    %cst_80 = arith.constant dense<0.000000e+00> : vector<2x8xf32>
    %185 = vector.multi_reduction <add>, %184, %cst_80 [2] : vector<2x8x8xf32> to vector<2x8xf32>
    %186 = vector.shape_cast %185 : vector<2x8xf32> to vector<2x8x1xf32>
    %187 = tpu.reciprocal %186 {approx = true} : vector<2x8x1xf32> -> vector<2x8x1xf32>
    %188 = vector.broadcast %187 : vector<2x8x1xf32> to vector<2x8x8xf32>
    %189 = arith.mulf %184, %188 : vector<2x8x8xf32>
    "tpu.trace_start"() <{level = 10 : i32, message = "bqk,bkd->bqd"}> : () -> ()
    %cst_81 = arith.constant dense<0.000000e+00> : vector<2x8x8xf32>
    %190 = tpu.matmul %189, %177, %cst_81 {dimension_numbers = #tpu.dot_dimension_numbers<[2], [1], [1], [2], [0, 0, 0, 1, 1, 2], [0], [0]>} : vector<2x8x8xf32>, vector<2x8x8xf32>, vector<2x8x8xf32> -> vector<2x8x8xf32>
    "tpu.trace_stop"() : () -> ()
    %191 = vector.extract_strided_slice %172 {offsets = [0, 0, 8], sizes = [2, 8, 8], strides = [1, 1, 1]} : vector<2x8x32xf32> to vector<2x8x8xf32>
    %192 = vector.extract_strided_slice %173 {offsets = [0, 0, 8], sizes = [2, 8, 8], strides = [1, 1, 1]} : vector<2x8x32xf32> to vector<2x8x8xf32>
    %193 = vector.extract_strided_slice %174 {offsets = [0, 0, 8], sizes = [2, 8, 8], strides = [1, 1, 1]} : vector<2x8x32xf32> to vector<2x8x8xf32>
    "tpu.trace_start"() <{level = 10 : i32, message = "bqd,bkd->bqk"}> : () -> ()
    %cst_82 = arith.constant dense<0.000000e+00> : vector<2x8x8xf32>
    %194 = tpu.matmul %191, %192, %cst_82 {dimension_numbers = #tpu.dot_dimension_numbers<[2], [2], [1], [1], [0, 0, 0, 1, 1, 1], [0], [0]>} : vector<2x8x8xf32>, vector<2x8x8xf32>, vector<2x8x8xf32> -> vector<2x8x8xf32>
    "tpu.trace_stop"() : () -> ()
    %195 = arith.addf %194, %0 : vector<2x8x8xf32>
    %cst_83 = arith.constant dense<0xFF800000> : vector<2x8xf32>
    %196 = vector.multi_reduction <maximumf>, %195, %cst_83 [2] : vector<2x8x8xf32> to vector<2x8xf32>
    %197 = vector.shape_cast %196 : vector<2x8xf32> to vector<2x8x1xf32>
    %198 = vector.broadcast %197 : vector<2x8x1xf32> to vector<2x8x8xf32>
    %199 = arith.subf %195, %198 : vector<2x8x8xf32>
    %200 = math.exp %199 : vector<2x8x8xf32>
    %cst_84 = arith.constant dense<0.000000e+00> : vector<2x8xf32>
    %201 = vector.multi_reduction <add>, %200, %cst_84 [2] : vector<2x8x8xf32> to vector<2x8xf32>
    %202 = vector.shape_cast %201 : vector<2x8xf32> to vector<2x8x1xf32>
    %203 = tpu.reciprocal %202 {approx = true} : vector<2x8x1xf32> -> vector<2x8x1xf32>
    %204 = vector.broadcast %203 : vector<2x8x1xf32> to vector<2x8x8xf32>
    %205 = arith.mulf %200, %204 : vector<2x8x8xf32>
    "tpu.trace_start"() <{level = 10 : i32, message = "bqk,bkd->bqd"}> : () -> ()
    %cst_85 = arith.constant dense<0.000000e+00> : vector<2x8x8xf32>
    %206 = tpu.matmul %205, %193, %cst_85 {dimension_numbers = #tpu.dot_dimension_numbers<[2], [1], [1], [2], [0, 0, 0, 1, 1, 2], [0], [0]>} : vector<2x8x8xf32>, vector<2x8x8xf32>, vector<2x8x8xf32> -> vector<2x8x8xf32>
    "tpu.trace_stop"() : () -> ()
    %207 = vector.extract_strided_slice %172 {offsets = [0, 0, 16], sizes = [2, 8, 8], strides = [1, 1, 1]} : vector<2x8x32xf32> to vector<2x8x8xf32>
    %208 = vector.extract_strided_slice %173 {offsets = [0, 0, 16], sizes = [2, 8, 8], strides = [1, 1, 1]} : vector<2x8x32xf32> to vector<2x8x8xf32>
    %209 = vector.extract_strided_slice %174 {offsets = [0, 0, 16], sizes = [2, 8, 8], strides = [1, 1, 1]} : vector<2x8x32xf32> to vector<2x8x8xf32>
    "tpu.trace_start"() <{level = 10 : i32, message = "bqd,bkd->bqk"}> : () -> ()
    %cst_86 = arith.constant dense<0.000000e+00> : vector<2x8x8xf32>
    %210 = tpu.matmul %207, %208, %cst_86 {dimension_numbers = #tpu.dot_dimension_numbers<[2], [2], [1], [1], [0, 0, 0, 1, 1, 1], [0], [0]>} : vector<2x8x8xf32>, vector<2x8x8xf32>, vector<2x8x8xf32> -> vector<2x8x8xf32>
    "tpu.trace_stop"() : () -> ()
    %211 = arith.addf %210, %0 : vector<2x8x8xf32>
    %cst_87 = arith.constant dense<0xFF800000> : vector<2x8xf32>
    %212 = vector.multi_reduction <maximumf>, %211, %cst_87 [2] : vector<2x8x8xf32> to vector<2x8xf32>
    %213 = vector.shape_cast %212 : vector<2x8xf32> to vector<2x8x1xf32>
    %214 = vector.broadcast %213 : vector<2x8x1xf32> to vector<2x8x8xf32>
    %215 = arith.subf %211, %214 : vector<2x8x8xf32>
    %216 = math.exp %215 : vector<2x8x8xf32>
    %cst_88 = arith.constant dense<0.000000e+00> : vector<2x8xf32>
    %217 = vector.multi_reduction <add>, %216, %cst_88 [2] : vector<2x8x8xf32> to vector<2x8xf32>
    %218 = vector.shape_cast %217 : vector<2x8xf32> to vector<2x8x1xf32>
    %219 = tpu.reciprocal %218 {approx = true} : vector<2x8x1xf32> -> vector<2x8x1xf32>
    %220 = vector.broadcast %219 : vector<2x8x1xf32> to vector<2x8x8xf32>
    %221 = arith.mulf %216, %220 : vector<2x8x8xf32>
    "tpu.trace_start"() <{level = 10 : i32, message = "bqk,bkd->bqd"}> : () -> ()
    %cst_89 = arith.constant dense<0.000000e+00> : vector<2x8x8xf32>
    %222 = tpu.matmul %221, %209, %cst_89 {dimension_numbers = #tpu.dot_dimension_numbers<[2], [1], [1], [2], [0, 0, 0, 1, 1, 2], [0], [0]>} : vector<2x8x8xf32>, vector<2x8x8xf32>, vector<2x8x8xf32> -> vector<2x8x8xf32>
    "tpu.trace_stop"() : () -> ()
    %223 = vector.extract_strided_slice %172 {offsets = [0, 0, 24], sizes = [2, 8, 8], strides = [1, 1, 1]} : vector<2x8x32xf32> to vector<2x8x8xf32>
    %224 = vector.extract_strided_slice %173 {offsets = [0, 0, 24], sizes = [2, 8, 8], strides = [1, 1, 1]} : vector<2x8x32xf32> to vector<2x8x8xf32>
    %225 = vector.extract_strided_slice %174 {offsets = [0, 0, 24], sizes = [2, 8, 8], strides = [1, 1, 1]} : vector<2x8x32xf32> to vector<2x8x8xf32>
    "tpu.trace_start"() <{level = 10 : i32, message = "bqd,bkd->bqk"}> : () -> ()
    %cst_90 = arith.constant dense<0.000000e+00> : vector<2x8x8xf32>
    %226 = tpu.matmul %223, %224, %cst_90 {dimension_numbers = #tpu.dot_dimension_numbers<[2], [2], [1], [1], [0, 0, 0, 1, 1, 1], [0], [0]>} : vector<2x8x8xf32>, vector<2x8x8xf32>, vector<2x8x8xf32> -> vector<2x8x8xf32>
    "tpu.trace_stop"() : () -> ()
    %227 = arith.addf %226, %0 : vector<2x8x8xf32>
    %cst_91 = arith.constant dense<0xFF800000> : vector<2x8xf32>
    %228 = vector.multi_reduction <maximumf>, %227, %cst_91 [2] : vector<2x8x8xf32> to vector<2x8xf32>
    %229 = vector.shape_cast %228 : vector<2x8xf32> to vector<2x8x1xf32>
    %230 = vector.broadcast %229 : vector<2x8x1xf32> to vector<2x8x8xf32>
    %231 = arith.subf %227, %230 : vector<2x8x8xf32>
    %232 = math.exp %231 : vector<2x8x8xf32>
    %cst_92 = arith.constant dense<0.000000e+00> : vector<2x8xf32>
    %233 = vector.multi_reduction <add>, %232, %cst_92 [2] : vector<2x8x8xf32> to vector<2x8xf32>
    %234 = vector.shape_cast %233 : vector<2x8xf32> to vector<2x8x1xf32>
    %235 = tpu.reciprocal %234 {approx = true} : vector<2x8x1xf32> -> vector<2x8x1xf32>
    %236 = vector.broadcast %235 : vector<2x8x1xf32> to vector<2x8x8xf32>
    %237 = arith.mulf %232, %236 : vector<2x8x8xf32>
    "tpu.trace_start"() <{level = 10 : i32, message = "bqk,bkd->bqd"}> : () -> ()
    %cst_93 = arith.constant dense<0.000000e+00> : vector<2x8x8xf32>
    %238 = tpu.matmul %237, %225, %cst_93 {dimension_numbers = #tpu.dot_dimension_numbers<[2], [1], [1], [2], [0, 0, 0, 1, 1, 2], [0], [0]>} : vector<2x8x8xf32>, vector<2x8x8xf32>, vector<2x8x8xf32> -> vector<2x8x8xf32>
    "tpu.trace_stop"() : () -> ()
    %239 = tpu.concatenate %190, %206, %222, %238 in 2 : vector<2x8x8xf32>, vector<2x8x8xf32>, vector<2x8x8xf32>, vector<2x8x8xf32> -> vector<2x8x32xf32>
    %240 = vector.shape_cast %239 : vector<2x8x32xf32> to vector<16x32xf32>
    %c1_94 = arith.constant 1 : index
    %c0_95 = arith.constant 0 : index
    %c0_96 = arith.constant 0 : index
    %241 = vector.load %arg4[%c1_94, %c0_95, %c0_96] : memref<2x32x32xf32, #tpu.memory_space<vmem>>, vector<1x32x32xf32>
    %242 = vector.shape_cast %241 : vector<1x32x32xf32> to vector<32x32xf32>
    %cst_97 = arith.constant dense<0.000000e+00> : vector<16x32xf32>
    %243 = tpu.matmul %240, %242, %cst_97 {dimension_numbers = #tpu.dot_dimension_numbers<[1], [0], [0], [1], [0, 0, 1, 1], [], []>} : vector<16x32xf32>, vector<32x32xf32>, vector<16x32xf32> -> vector<16x32xf32>
    %c1_98 = arith.constant 1 : index
    %c0_99 = arith.constant 0 : index
    %c0_100 = arith.constant 0 : index
    %244 = vector.load %arg5[%c1_98, %c0_99, %c0_100] : memref<2x1x32xf32, #tpu.memory_space<vmem>>, vector<1x1x32xf32>
    %245 = vector.shape_cast %244 : vector<1x1x32xf32> to vector<1x32xf32>
    %246 = vector.broadcast %245 : vector<1x32xf32> to vector<16x32xf32>
    %247 = arith.addf %243, %246 : vector<16x32xf32>
    %248 = arith.addf %159, %247 : vector<16x32xf32>
    %c1_101 = arith.constant 1 : index
    %c0_102 = arith.constant 0 : index
    %c0_103 = arith.constant 0 : index
    %249 = vector.load %arg6[%c1_101, %c0_102, %c0_103] : memref<2x1x32xf32, #tpu.memory_space<vmem>>, vector<1x1x32xf32>
    %250 = vector.shape_cast %249 : vector<1x1x32xf32> to vector<1x32xf32>
    %c1_104 = arith.constant 1 : index
    %c0_105 = arith.constant 0 : index
    %c0_106 = arith.constant 0 : index
    %251 = vector.load %arg7[%c1_104, %c0_105, %c0_106] : memref<2x1x32xf32, #tpu.memory_space<vmem>>, vector<1x1x32xf32>
    %252 = vector.shape_cast %251 : vector<1x1x32xf32> to vector<1x32xf32>
    %cst_107 = arith.constant dense<0.000000e+00> : vector<16xf32>
    %253 = vector.multi_reduction <add>, %248, %cst_107 [1] : vector<16x32xf32> to vector<16xf32>
    %254 = vector.shape_cast %253 : vector<16xf32> to vector<16x1xf32>
    %cst_108 = arith.constant 3.200000e+01 : f32
    %255 = vector.broadcast %cst_108 : f32 to vector<16x1xf32>
    %256 = arith.divf %254, %255 : vector<16x1xf32>
    %257 = vector.broadcast %256 : vector<16x1xf32> to vector<16x32xf32>
    %258 = arith.subf %248, %257 : vector<16x32xf32>
    %259 = arith.mulf %258, %258 : vector<16x32xf32>
    %cst_109 = arith.constant dense<0.000000e+00> : vector<16xf32>
    %260 = vector.multi_reduction <add>, %259, %cst_109 [1] : vector<16x32xf32> to vector<16xf32>
    %261 = vector.shape_cast %260 : vector<16xf32> to vector<16x1xf32>
    %cst_110 = arith.constant 3.200000e+01 : f32
    %262 = vector.broadcast %cst_110 : f32 to vector<16x1xf32>
    %263 = arith.divf %261, %262 : vector<16x1xf32>
    %264 = vector.broadcast %256 : vector<16x1xf32> to vector<16x32xf32>
    %265 = arith.subf %248, %264 : vector<16x32xf32>
    %cst_111 = arith.constant 9.99999974E-6 : f32
    %266 = vector.broadcast %cst_111 : f32 to vector<16x1xf32>
    %267 = arith.addf %263, %266 : vector<16x1xf32>
    %268 = math.rsqrt %267 : vector<16x1xf32>
    %269 = vector.broadcast %268 : vector<16x1xf32> to vector<16x32xf32>
    %270 = arith.mulf %265, %269 : vector<16x32xf32>
    %271 = vector.broadcast %250 : vector<1x32xf32> to vector<16x32xf32>
    %272 = arith.mulf %270, %271 : vector<16x32xf32>
    %273 = vector.broadcast %252 : vector<1x32xf32> to vector<16x32xf32>
    %274 = arith.addf %272, %273 : vector<16x32xf32>
    %c1_112 = arith.constant 1 : index
    %c0_113 = arith.constant 0 : index
    %c0_114 = arith.constant 0 : index
    %275 = vector.load %arg8[%c1_112, %c0_113, %c0_114] : memref<2x32x64xf32, #tpu.memory_space<vmem>>, vector<1x32x64xf32>
    %276 = vector.shape_cast %275 : vector<1x32x64xf32> to vector<32x64xf32>
    %cst_115 = arith.constant dense<0.000000e+00> : vector<16x64xf32>
    %277 = tpu.matmul %274, %276, %cst_115 {dimension_numbers = #tpu.dot_dimension_numbers<[1], [0], [0], [1], [0, 0, 1, 1], [], []>} : vector<16x32xf32>, vector<32x64xf32>, vector<16x64xf32> -> vector<16x64xf32>
    %c1_116 = arith.constant 1 : index
    %c0_117 = arith.constant 0 : index
    %c0_118 = arith.constant 0 : index
    %278 = vector.load %arg9[%c1_116, %c0_117, %c0_118] : memref<2x1x64xf32, #tpu.memory_space<vmem>>, vector<1x1x64xf32>
    %279 = vector.shape_cast %278 : vector<1x1x64xf32> to vector<1x64xf32>
    %280 = vector.broadcast %279 : vector<1x64xf32> to vector<16x64xf32>
    %281 = arith.addf %277, %280 : vector<16x64xf32>
    %cst_119 = arith.constant 0.000000e+00 : f32
    %282 = vector.broadcast %cst_119 : f32 to vector<16x64xf32>
    %283 = arith.maximumf %281, %282 : vector<16x64xf32>
    %c1_120 = arith.constant 1 : index
    %c0_121 = arith.constant 0 : index
    %c0_122 = arith.constant 0 : index
    %284 = vector.load %arg10[%c1_120, %c0_121, %c0_122] : memref<2x64x32xf32, #tpu.memory_space<vmem>>, vector<1x64x32xf32>
    %285 = vector.shape_cast %284 : vector<1x64x32xf32> to vector<64x32xf32>
    %cst_123 = arith.constant dense<0.000000e+00> : vector<16x32xf32>
    %286 = tpu.matmul %283, %285, %cst_123 {dimension_numbers = #tpu.dot_dimension_numbers<[1], [0], [0], [1], [0, 0, 1, 1], [], []>} : vector<16x64xf32>, vector<64x32xf32>, vector<16x32xf32> -> vector<16x32xf32>
    %c1_124 = arith.constant 1 : index
    %c0_125 = arith.constant 0 : index
    %c0_126 = arith.constant 0 : index
    %287 = vector.load %arg11[%c1_124, %c0_125, %c0_126] : memref<2x1x32xf32, #tpu.memory_space<vmem>>, vector<1x1x32xf32>
    %288 = vector.shape_cast %287 : vector<1x1x32xf32> to vector<1x32xf32>
    %289 = vector.broadcast %288 : vector<1x32xf32> to vector<16x32xf32>
    %290 = arith.addf %286, %289 : vector<16x32xf32>
    %291 = arith.addf %274, %290 : vector<16x32xf32>
    %c1_127 = arith.constant 1 : index
    %c0_128 = arith.constant 0 : index
    %c0_129 = arith.constant 0 : index
    %292 = vector.load %arg12[%c1_127, %c0_128, %c0_129] : memref<2x1x32xf32, #tpu.memory_space<vmem>>, vector<1x1x32xf32>
    %293 = vector.shape_cast %292 : vector<1x1x32xf32> to vector<1x32xf32>
    %c1_130 = arith.constant 1 : index
    %c0_131 = arith.constant 0 : index
    %c0_132 = arith.constant 0 : index
    %294 = vector.load %arg13[%c1_130, %c0_131, %c0_132] : memref<2x1x32xf32, #tpu.memory_space<vmem>>, vector<1x1x32xf32>
    %295 = vector.shape_cast %294 : vector<1x1x32xf32> to vector<1x32xf32>
    %cst_133 = arith.constant dense<0.000000e+00> : vector<16xf32>
    %296 = vector.multi_reduction <add>, %291, %cst_133 [1] : vector<16x32xf32> to vector<16xf32>
    %297 = vector.shape_cast %296 : vector<16xf32> to vector<16x1xf32>
    %cst_134 = arith.constant 3.200000e+01 : f32
    %298 = vector.broadcast %cst_134 : f32 to vector<16x1xf32>
    %299 = arith.divf %297, %298 : vector<16x1xf32>
    %300 = vector.broadcast %299 : vector<16x1xf32> to vector<16x32xf32>
    %301 = arith.subf %291, %300 : vector<16x32xf32>
    %302 = arith.mulf %301, %301 : vector<16x32xf32>
    %cst_135 = arith.constant dense<0.000000e+00> : vector<16xf32>
    %303 = vector.multi_reduction <add>, %302, %cst_135 [1] : vector<16x32xf32> to vector<16xf32>
    %304 = vector.shape_cast %303 : vector<16xf32> to vector<16x1xf32>
    %cst_136 = arith.constant 3.200000e+01 : f32
    %305 = vector.broadcast %cst_136 : f32 to vector<16x1xf32>
    %306 = arith.divf %304, %305 : vector<16x1xf32>
    %307 = vector.broadcast %299 : vector<16x1xf32> to vector<16x32xf32>
    %308 = arith.subf %291, %307 : vector<16x32xf32>
    %cst_137 = arith.constant 9.99999974E-6 : f32
    %309 = vector.broadcast %cst_137 : f32 to vector<16x1xf32>
    %310 = arith.addf %306, %309 : vector<16x1xf32>
    %311 = math.rsqrt %310 : vector<16x1xf32>
    %312 = vector.broadcast %311 : vector<16x1xf32> to vector<16x32xf32>
    %313 = arith.mulf %308, %312 : vector<16x32xf32>
    %314 = vector.broadcast %293 : vector<1x32xf32> to vector<16x32xf32>
    %315 = arith.mulf %313, %314 : vector<16x32xf32>
    %316 = vector.broadcast %295 : vector<1x32xf32> to vector<16x32xf32>
    %317 = arith.addf %315, %316 : vector<16x32xf32>
    %c0_138 = arith.constant 0 : index
    %c0_139 = arith.constant 0 : index
    %318 = vector.load %arg14[%c0_138, %c0_139] : memref<16x32xf32, #tpu.memory_space<vmem>>, vector<16x32xf32>
    tpu.vector_store %arg14[%c0_138, %c0_139], %317 {strides = array<i32>} : memref<16x32xf32, #tpu.memory_space<vmem>>, vector<16x32xf32>,
    return
  }
}

</mosaic_0001>

<bundles_post_ra>
// kernel: encoder_forward.1
= control target key start
LH: loop header
LB: loop body
LE: loop exit
PB: predicated region body
PF: predicated region fallthrough
CT: control target
= control target key end

     0   :  { %vm60_vm0 = vcmask 261120   ;;  %s2563_s0 = inlined_call_operand.vmem [shape: f32[16,32], index: 0, kind: input, shape index: {}]   ;;  %s2564_s1 = inlined_call_operand.vmem [shape: f32[2,8,8], index: 1, kind: input, shape index: {}]   ;;  %s2565_s2 = inlined_call_operand.vmem [shape: f32[2,32,96], index: 2, kind: input, shape index: {}]   ;;  %s2566_s3 = inlined_call_operand.vmem [shape: f32[2,1,96], index: 3, kind: input, shape index: {}]   ;;  %s2567_s4 = inlined_call_operand.vmem [shape: f32[2,32,32], index: 4, kind: input, shape index: {}]   ;;  %s2568_s5 = inlined_call_operand.vmem [shape: f32[2,1,32], index: 5, kind: input, shape index: {}]   ;;  %s2569_s6 = inlined_call_operand.vmem [shape: f32[2,1,32], index: 6, kind: input, shape index: {}]   ;;  %s2570_s7 = inlined_call_operand.vmem [shape: f32[2,1,32], index: 7, kind: input, shape index: {}]   ;;  %s2571_s8 = inlined_call_operand.vmem [shape: f32[2,32,64], index: 8, kind: input, shape index: {}]   ;;  %s2572_s9 = inlined_call_operand.vmem [shape: f32[2,1,64], index: 9, kind: input, shape index: {}]   ;;  %s2573_s10 = inlined_call_operand.vmem [shape: f32[2,64,32], index: 10, kind: input, shape index: {}]   ;;  %s2574_s11 = inlined_call_operand.vmem [shape: f32[2,1,32], index: 11, kind: input, shape index: {}]   ;;  %s2575_s12 = inlined_call_operand.vmem [shape: f32[2,1,32], index: 12, kind: input, shape index: {}]   ;;  %s2576_s13 = inlined_call_operand.vmem [shape: f32[2,1,32], index: 13, kind: input, shape index: {}]   ;;  %s2577_s14 = inlined_call_operand.hbm [shape: f32[16,32], index: 14, kind: output, shape index: {}]  }
   0x1   :  { %v55_v0 = vld [vmem:[%s2565_s2 + $0x18] sm:$0xff]  ;;  %v54_v1 = vld [vmem:[%s2565_s2 + $0x10] sm:$0xff]  ;;  %v53_v2 = vld [vmem:[%s2565_s2 + $0x8] sm:$0xff] }
   0x2   :  { %79 = vmatpush.msra.mxu0 %v55_v0  ;;  %v52_v3 = vld [vmem:[%s2565_s2] sm:$0xff] }
   0x3   :  { %v2110_v4 = vld [vmem:[%s2563_s0] sm:$0xff] }
   0x4   :  { %80 = vmatpush.msra.mxu0 %v54_v1 }
   0x6   :  { %81 = vmatpush.msra.mxu0 %v53_v2 }
   0x8   :  { %82 = vmatpush.msra.mxu0 %v52_v3 }
   0x9   :  { %1740 = vmatmul.msk.f32.vlgmr.msra.gmra.mxu0 %vm60_vm0, %v2110_v4 }
   0xa   :  { %19 = vsyncpa [#allocation3], 0  ;;  %v2117_v5 = vld [vmem:[%s2563_s0 + $0x8] sm:$0xff]  ;;  %v1879_v6 = vld [vmem:[%s2566_s3] ss:$0 sm:$0xff]  ;;  %s2003_s27 = smov 88  }
   0xb   :  { %s2004_s28 = smov 96   ;;  %s2005_s0 = smov 80   ;;  %vm95_vm1 = vcmask 64512   ;;  %v2171_v27 = vld [vmem:[%s2564_s1] sm:$0xff]  ;;  %v2178_v31 = vld [vmem:[%s2564_s1 + $0x8] sm:$0xff]  ;;  %vm639_vm2 = vcmask 130048  }
   0xc   :  { %s2006_s29 = smov 120   ;;  %s2007_s30 = smov 72   ;;  %vm642_vm3 = vcmask 195584   ;;  %vm798_vm11 = vcmask 523264  }
   0xd   :  { %s2008_s15 = smov 112   ;;  %s2009_s16 = smov 104  }
   0xe   :  { %s2578_s1 = smov 56   ;;  %s2011_s21 = smov 64  }
   0xf   :  { %s2012_s22 = smov 48   ;;  %s2581_s23 = smov 40  }
  0x10   :  { %s2579_s24 = smov 8   ;;  %s2582_s25 = smov 16  }
  0x11   :  { %1741 = vmatmul.msk.f32.gmra.mxu0 %vm60_vm0, %v2117_v5  ;;  %s2016_s26 = smov 24  }
  0x86   :  { %v84_v7 = vpop.f32.mrf.mxu0 }
  0x87   :  { %v2124_v8 = vadd.f32 %v1879_v6, %v84_v7 }
  0x89   :  { %225 = vrot.lane.b32.xlu2 %v2124_v8, %s2003_s27  ;;  %93 = vrot.lane.b32.xlu0 %v2124_v8, %s2004_s28  ;;  %v90_v12 = vmul.f32 0.35355338, %v2124_v8 }
  0x8e   :  { %v87_v9 = vpop.f32.mrf.mxu0 }
  0x8f   :  { %v2130_v10 = vadd.f32 %v1879_v6, %v87_v9 }
  0x91   :  { %253 = vrot.lane.b32.xlu1 %v2130_v10, %s2003_s27  ;;  %355 = vrot.lane.b32.xlu2 %v2124_v8, %s2005_s0  ;;  %v91_v11 = vmul.f32 0.35355338, %v2130_v10  ;;  %v1854_v53 = vpack.i.bf16 %v2130_v10, %v2124_v8 }
  0x92   :  { %122 = vrot.lane.b32.xlu0 %v2130_v10, %s2004_s28 }
  0x99   :  { %251 = vrot.lane.b32.xlu1 %v91_v11, %s2006_s29  ;;  %485 = vrot.lane.b32.xlu2 %v2124_v8, %s2007_s30 }
  0x9a   :  { %223 = vrot.lane.b32.xlu0 %v90_v12, %s2006_s29 }
  0xa1   :  { %381 = vrot.lane.b32.xlu2 %v91_v11, %s2008_s15  ;;  %353 = vrot.lane.b32.xlu1 %v90_v12, %s2008_s15 }
  0xa2   :  { %483 = vrot.lane.b32.xlu0 %v90_v12, %s2009_s16 }
  0xa9   :  { %383 = vrot.lane.b32.xlu1 %v2130_v10, %s2005_s0 }
  0xaa   :  { %513 = vrot.lane.b32.xlu0 %v2130_v10, %s2007_s30 }
  0xb1   :  { %511 = vrot.lane.b32.xlu1 %v91_v11, %s2009_s16 }
  0xe3   :  { %v226_v13 = vpop.permute.xlu2 %225 }
  0xe4   :  { %1748 = vmatpush.xpose.msk.msra.mxu1 %vm95_vm1, %v226_v13 }
  0xeb   :  { %v356_v17 = vpop.permute.xlu2 %355 }
  0xf3   :  { %v486_v20 = vpop.permute.xlu2 %485 }
  0xfb   :  { %v94_v14 = vpop.permute.xlu0 %93  ;;  %v382_v25 = vpop.permute.xlu2 %381 }
  0xfc   :  { %1742 = vmatpush.xpose.msk.msra.mxu2 %vm95_vm1, %v94_v14 }
  0xff   :  { %1743 = vmatmul.msk.f32.vlgmr.msra.gmra.mxu2 %vm95_vm1, %v90_v12 }
 0x103   :  { %v254_v15 = vpop.permute.xlu1 %253 }
 0x104   :  { %v123_v16 = vpop.permute.xlu0 %122 }
 0x105   :  { %1744 = vmatpush.xpose.msk.msrb.mxu2 %vm95_vm1, %v123_v16 }
 0x108   :  { %1745 = vmatmul.msk.f32.vlgmr.msrb.gmra.mxu2 %vm95_vm1, %v91_v11 }
 0x109   :  { %1750 = vmatpush.xpose.msk.msra.mxu2 %vm95_vm1, %v254_v15 }
 0x10b   :  { %v252_v18 = vpop.permute.xlu1 %251 }
 0x10c   :  { %v224_v19 = vpop.permute.xlu0 %223 }
 0x10d   :  { %1754 = vmatpush.xpose.msk.msrb.mxu2 %vm95_vm1, %v356_v17  ;;  %1749 = vmatmul.msk.f32.vlgmr.msra.gmra.mxu1 %vm95_vm1, %v224_v19 }
 0x110   :  { %1751 = vmatmul.msk.f32.vlgmr.msra.gmra.mxu2 %vm95_vm1, %v252_v18 }
 0x111   :  { %1760 = vmatpush.xpose.msk.msra.mxu2 %vm95_vm1, %v486_v20 }
 0x113   :  { %v354_v21 = vpop.permute.xlu1 %353 }
 0x114   :  { %v484_v22 = vpop.permute.xlu0 %483 }
 0x118   :  { %1755 = vmatmul.msk.f32.vlgmr.msrb.gmra.mxu2 %vm95_vm1, %v354_v21 }
 0x11b   :  { %v384_v23 = vpop.permute.xlu1 %383 }
 0x11c   :  { %v514_v24 = vpop.permute.xlu0 %513  ;;  %1756 = vmatpush.xpose.msk.msrb.mxu0 %vm95_vm1, %v384_v23 }
 0x11f   :  { %1757 = vmatmul.msk.f32.vlgmr.msrb.gmra.mxu0 %vm95_vm1, %v382_v25 }
 0x120   :  { %1762 = vmatpush.xpose.msk.msra.mxu0 %vm95_vm1, %v514_v24  ;;  %1761 = vmatmul.msk.f32.vlgmr.msra.gmra.mxu2 %vm95_vm1, %v484_v22 }
 0x123   :  { %v512_v26 = vpop.permute.xlu1 %511 }
 0x127   :  { %1763 = vmatmul.msk.f32.vlgmr.msra.gmra.mxu0 %vm95_vm1, %v512_v26 }
 0x182   :  { %v118_v28 = vpop.f32.mrf.mxu2 }
 0x183   :  { %v119_v29 = vadd.f32 %v118_v28, %v2171_v27 }
 0x185   :  { %v149_v30 = vsel %vm95_vm1, %v119_v29, -inf }
 0x186   :  { %150 = vmax.xlane.f32.xlu2 %v149_v30 }
 0x18a   :  { %v248_v32 = vpop.f32.mrf.mxu1 }
 0x18b   :  { %v249_v33 = vadd.f32 %v248_v32, %v2171_v27  ;;  %v146_v34 = vpop.f32.mrf.mxu2 }
 0x18c   :  { %v147_v35 = vadd.f32 %v146_v34, %v2178_v31 }
 0x18d   :  { %v279_v36 = vsel %vm95_vm1, %v249_v33, -inf }
 0x18e   :  { %280 = vmax.xlane.f32.xlu1 %v279_v36  ;;  %v152_v37 = vsel %vm95_vm1, %v147_v35, -inf }
 0x18f   :  { %153 = vmax.xlane.f32.xlu0 %v152_v37 }
 0x193   :  { %v276_v38 = vpop.f32.mrf.mxu2 }
 0x194   :  { %v277_v49 = vadd.f32 %v276_v38, %v2178_v31 }
 0x196   :  { %v282_v50 = vsel %vm95_vm1, %v277_v49, -inf }
 0x19b   :  { %v378_v39 = vpop.f32.mrf.mxu2 }
 0x19c   :  { %v406_v40 = vpop.f32.mrf.mxu0  ;;  %v379_v51 = vadd.f32 %v378_v39, %v2171_v27 }
 0x19d   :  { %v407_v41 = vadd.f32 %v406_v40, %v2178_v31 }
 0x19e   :  { %v409_v52 = vsel %vm95_vm1, %v379_v51, -inf }
 0x19f   :  { %v412_v42 = vsel %vm95_vm1, %v407_v41, -inf }
 0x1a0   :  { %413 = vmax.xlane.f32.xlu1 %v412_v42 }
 0x1a3   :  { %v508_v43 = vpop.f32.mrf.mxu2 }
 0x1a4   :  { %v2187_v44 = vadd.f32 %v508_v43, %v2171_v27  ;;  %v536_v45 = vpop.f32.mrf.mxu0 }
 0x1a5   :  { %v537_v46 = vadd.f32 %v536_v45, %v2178_v31 }
 0x1a6   :  { %v539_v47 = vsel %vm95_vm1, %v2187_v44, -inf }
 0x1a7   :  { %540 = vmax.xlane.f32.xlu0 %v539_v47  ;;  %v542_v48 = vsel %vm95_vm1, %v537_v46, -inf }
 0x1a8   :  { %543 = vmax.xlane.f32.xlu2 %v542_v48 }
 0x1b0   :  { %283 = vmax.xlane.f32.xlu2 %v282_v50 }
 0x1b8   :  { %410 = vmax.xlane.f32.xlu2 %v409_v52 }
 0x1bb   :  { %1855 = vrot.lane.b32.xlu0 %v1854_v53, %s2578_s1 }
 0x1d0   :  { %1850 = vrot.lane.b32.xlu2 %v1854_v53, %s2011_s21 }
 0x1d8   :  { %431 = vrot.lane.b32.xlu2 %v2124_v8, %s2012_s22 }
 0x1f9   :  { %v151_v54 = vpop.xlane.xlu2 %150 }
 0x1fa   :  { %v155_v57 = vsub.f32 %v119_v29, %v151_v54 }
 0x1fc   :  { %v157_v59 = vmul.f32 1.442695, %v155_v57 }
 0x201   :  { %v281_v55 = vpop.xlane.xlu1 %280 }
 0x202   :  { %v285_v56 = vsub.f32 %v249_v33, %v281_v55  ;;  %v154_v63 = vpop.xlane.xlu0 %153 }
 0x203   :  { %v156_v3 = vsub.f32 %v147_v35, %v154_v63 }
 0x204   :  { %v287_v58 = vmul.f32 1.442695, %v285_v56 }
 0x205   :  { %v159_v7 = vmul.f32 1.442695, %v156_v3 }
 0x206   :  { %1895 = vpow2.f32 %v287_v58 }
 0x207   :  { %1897 = vpow2.f32 %v157_v59 }
 0x20c   :  { %v2203_v60 = vpop.eup %1895 }
 0x20d   :  { %v291_v61 = vsel %vm95_vm1, %v2203_v60, 0.0  ;;  %v1898_v62 = vpop.eup %1897 }
 0x20e   :  { %292 = vadd.xlane.f32.xlu0 %v291_v61  ;;  %v161_v2 = vsel %vm95_vm1, %v1898_v62, 0.0 }
 0x213   :  { %v414_v0 = vpop.xlane.xlu1 %413 }
 0x214   :  { %v416_v1 = vsub.f32 %v407_v41, %v414_v0 }
 0x216   :  { %v419_v6 = vmul.f32 1.442695, %v416_v1  ;;  %162 = vadd.xlane.f32.xlu0 %v161_v2 }
 0x218   :  { %1899 = vpow2.f32 %v419_v6 }
 0x219   :  { %1901 = vpow2.f32 %v159_v7 }
 0x21a   :  { %v541_v18 = vpop.xlane.xlu0 %540 }
 0x21b   :  { %v544_v9 = vpop.xlane.xlu2 %543  ;;  %v545_v28 = vsub.f32 %v2187_v44, %v541_v18  ;;  %v646_v18 = vld [vmem:[%s2567_s4 + $0x8] sm:$0xff] }
 0x21c   :  { %v546_v11 = vsub.f32 %v537_v46, %v544_v9 }
 0x21d   :  { %v547_v33 = vmul.f32 1.442695, %v545_v28 }
 0x21e   :  { %v2208_v12 = vpop.eup %1899  ;;  %v549_v13 = vmul.f32 1.442695, %v546_v11 }
 0x21f   :  { %v424_v14 = vsel %vm95_vm1, %v2208_v12, 0.0  ;;  %v1902_v16 = vpop.eup %1901 }
 0x220   :  { %1903 = vpow2.f32 %v549_v13  ;;  %425 = vadd.xlane.f32.xlu1 %v424_v14  ;;  %v164_v21 = vsel %vm95_vm1, %v1902_v16, 0.0 }
 0x223   :  { %v284_v15 = vpop.xlane.xlu2 %283 }
 0x224   :  { %v286_v17 = vsub.f32 %v277_v49, %v284_v15 }
 0x226   :  { %v2212_v19 = vpop.eup %1903  ;;  %v289_v20 = vmul.f32 1.442695, %v286_v17  ;;  %v647_v17 = vld [vmem:[%s2567_s4 + $0x10] sm:$0xff] }
 0x227   :  { %v554_v22 = vsel %vm95_vm1, %v2212_v19, 0.0 }
 0x228   :  { %1905 = vpow2.f32 %v289_v20  ;;  %165 = vadd.xlane.f32.xlu1 %v164_v21  ;;  %555 = vadd.xlane.f32.xlu2 %v554_v22 }
 0x22a   :  { %561 = vrot.lane.b32.xlu0 %v2124_v8, %s2581_s23 }
 0x22b   :  { %v411_v23 = vpop.xlane.xlu2 %410 }
 0x22c   :  { %v415_v24 = vsub.f32 %v379_v51, %v411_v23 }
 0x22d   :  { %v1856_v25 = vpop.permute.xlu0 %1855 }
 0x22e   :  { %v1906_v26 = vpop.eup %1905  ;;  %v417_v29 = vmul.f32 1.442695, %v415_v24  ;;  %v1858_v30 = vunpack.i.h.bf16 %v1856_v25  ;;  %v1857_v44 = vunpack.i.l.bf16 %v1856_v25 }
 0x22f   :  { %v294_v32 = vsel %vm95_vm1, %v1906_v26, 0.0 }
 0x230   :  { %1907 = vpow2.f32 %v417_v29  ;;  %348 = vmatpush.msrb.mxu1 %v1858_v30  ;;  %295 = vadd.xlane.f32.xlu1 %v294_v32 }
 0x231   :  { %1909 = vpow2.f32 %v547_v33 }
 0x232   :  { %587 = vrot.lane.b32.xlu0 %v2130_v10, %s2581_s23 }
 0x233   :  { %v1851_v34 = vpop.permute.xlu2 %1850 }
 0x234   :  { %v1852_v35 = vunpack.i.l.bf16 %v1851_v34  ;;  %v1853_v8 = vunpack.i.h.bf16 %v1851_v34  ;;  %v1880_v34 = vld [vmem:[%s2568_s5] ss:$0 sm:$0xff] }
 0x236   :  { %v1908_v36 = vpop.eup %1907  ;;  %192 = vmatpush.msra.mxu3 %v1852_v35 }
 0x237   :  { %v421_v37 = vsel %vm95_vm1, %v1908_v36, 0.0  ;;  %v1910_v38 = vpop.eup %1909 }
 0x238   :  { %218 = vmatpush.msrb.mxu3 %v1853_v8  ;;  %422 = vadd.xlane.f32.xlu1 %v421_v37  ;;  %v551_v39 = vsel %vm95_vm1, %v1910_v38, 0.0 }
 0x23b   :  { %v432_v50 = vpop.permute.xlu2 %431 }
 0x240   :  { %552 = vadd.xlane.f32.xlu1 %v551_v39 }
 0x259   :  { %457 = vrot.lane.b32.xlu1 %v2130_v10, %s2012_s22 }
 0x281   :  { %v293_v40 = vpop.xlane.xlu0 %292 }
 0x289   :  { %v163_v41 = vpop.xlane.xlu0 %162 }
 0x28a   :  { %1911 = vrcp.f32 %v163_v41 }
 0x290   :  { %v1912_v42 = vpop.eup %1911 }
 0x291   :  { %v169_v43 = vmul.f32 %v1912_v42, %v1898_v62  ;;  %v2017_v42 = vmov 32.0  }
 0x293   :  { %1746 = vmatmul.msk.f32.vlgmr.msra.gmra.mxu3 %vm95_vm1, %v169_v43  ;;  %v426_v45 = vpop.xlane.xlu1 %425 }
 0x294   :  { %322 = vmatpush.msra.mxu3 %v1857_v44 }
 0x29b   :  { %v166_v46 = vpop.xlane.xlu1 %165 }
 0x29c   :  { %1913 = vrcp.f32 %v166_v46  ;;  %v562_v55 = vpop.permute.xlu0 %561 }
 0x29d   :  { %1915 = vrcp.f32 %v293_v40 }
 0x2a2   :  { %v1914_v47 = vpop.eup %1913 }
 0x2a3   :  { %v296_v48 = vpop.xlane.xlu1 %295  ;;  %v170_v49 = vmul.f32 %v1914_v47, %v1902_v16  ;;  %v1916_v10 = vpop.eup %1915  ;;  %v648_v16 = vld [vmem:[%s2567_s4 + $0x18] sm:$0xff] }
 0x2a4   :  { %1917 = vrcp.f32 %v296_v48  ;;  %v299_v52 = vmul.f32 %v1916_v10, %v2203_v60  ;;  %v556_v60 = vpop.xlane.xlu2 %555  ;;  %v588_v1 = vpop.permute.xlu0 %587  ;;  %671 = vmatpush.msrb.mxu2 %v648_v16 }
 0x2a5   :  { %1747 = vmatmul.msk.f32.vlgmr.msrb.gmra.mxu3 %vm95_vm1, %v170_v49 }
 0x2a6   :  { %452 = vmatpush.msrb.mxu3 %v432_v50  ;;  %672 = vmatpush.msrb.mxu2 %v647_v17  ;;  %v789_v17 = vld [vmem:[%s2573_s10 + $0x18] sm:$0xff] }
 0x2a8   :  { %673 = vmatpush.msrb.mxu2 %v646_v18 }
 0x2aa   :  { %v1918_v51 = vpop.eup %1917 }
 0x2ab   :  { %v423_v53 = vpop.xlane.xlu1 %422  ;;  %v300_v54 = vmul.f32 %v1918_v51, %v1906_v26 }
 0x2ac   :  { %1919 = vrcp.f32 %v423_v53 }
 0x2ad   :  { %1752 = vmatmul.msk.f32.vlgmr.msra.gmra.mxu3 %vm95_vm1, %v299_v52  ;;  %1753 = vmatmul.msk.f32.vlgmr.msrb.gmra.mxu1 %vm95_vm1, %v300_v54 }
 0x2ae   :  { %582 = vmatpush.msra.mxu3 %v562_v55 }
 0x2b2   :  { %v1920_v56 = vpop.eup %1919 }
 0x2b3   :  { %v429_v57 = vmul.f32 %v1920_v56, %v1908_v36  ;;  %v553_v58 = vpop.xlane.xlu1 %552  ;;  %v750_v56 = vld [vmem:[%s2571_s8 + $0x18] sm:$0xff] }
 0x2b4   :  { %1921 = vrcp.f32 %v553_v58  ;;  %773 = vmatpush.msrb.mxu0 %v750_v56  ;;  %v748_v58 = vld [vmem:[%s2571_s8 + $0x8] sm:$0xff] }
 0x2b5   :  { %1758 = vmatmul.msk.f32.vlgmr.msrb.gmra.mxu3 %vm95_vm1, %v429_v57  ;;  %1923 = vrcp.f32 %v426_v45  ;;  %v749_v57 = vld [vmem:[%s2571_s8 + $0x10] sm:$0xff] }
 0x2b6   :  { %1925 = vrcp.f32 %v556_v60  ;;  %774 = vmatpush.msrb.mxu0 %v749_v57 }
 0x2b7   :  { %1927 = vrcp.f32 %v2017_v42 }
 0x2b8   :  { %775 = vmatpush.msrb.mxu0 %v748_v58 }
 0x2ba   :  { %v1922_v59 = vpop.eup %1921 }
 0x2bb   :  { %v559_v61 = vmul.f32 %v1922_v59, %v1910_v38  ;;  %v1924_v62 = vpop.eup %1923  ;;  %v747_v59 = vld [vmem:[%s2571_s8] sm:$0xff] }
 0x2bc   :  { %v430_v63 = vmul.f32 %v1924_v62, %v2208_v12  ;;  %v1926_v2 = vpop.eup %1925  ;;  %776 = vmatpush.msrb.mxu0 %v747_v59 }
 0x2bd   :  { %1764 = vmatmul.msk.f32.vlgmr.msra.gmra.mxu3 %vm95_vm1, %v559_v61  ;;  %v560_v3 = vmul.f32 %v1926_v2, %v2212_v19  ;;  %v645_v19 = vld [vmem:[%s2567_s4] sm:$0xff]  ;;  %v1928_v43 = vpop.eup %1927  ;;  %v793_v2 = vld [vmem:[%s2573_s10 + $0x38] sm:$0xff] }
 0x2be   :  { %674 = vmatpush.msrb.mxu2 %v645_v19  ;;  %v693_v44 = vmul.f32 32.0, %v1928_v43  ;;  %vm697_vm4 = vweird.f32 %v1928_v43  ;;  %813 = vmatpush.msrb.mxu3 %v793_v2 }
 0x2c0   :  { %v694_v45 = vsub.f32 1.0, %v693_v44  ;;  %v1884_v44 = vld [vmem:[%s2574_s11] ss:$0 sm:$0xff] }
 0x2c2   :  { %v695_v46 = vmul.f32 %v1928_v43, %v694_v45 }
 0x2c4   :  { %v696_v47 = vadd.f32 %v1928_v43, %v695_v46 }
 0x2c6   :  { %v2271_v48 = vsel %vm697_vm4, %v1928_v43, %v696_v47 }
 0x2cb   :  { %v458_v0 = vpop.permute.xlu1 %457 }
 0x2cc   :  { %478 = vmatpush.msra.mxu1 %v458_v0 }
 0x2cd   :  { %1759 = vmatmul.msk.f32.vlgmr.msra.gmra.mxu1 %vm95_vm1, %v430_v63 }
 0x2ce   :  { %608 = vmatpush.msrb.mxu1 %v588_v1 }
 0x2d5   :  { %1765 = vmatmul.msk.f32.vlgmr.msrb.gmra.mxu1 %vm95_vm1, %v560_v3  ;;  %v792_v3 = vld [vmem:[%s2573_s10 + $0x30] sm:$0xff] }
 0x2d6   :  { %814 = vmatpush.msrb.mxu3 %v792_v3 }
 0x316   :  { %v194_v6 = vpop.f32.mrf.mxu3 }
 0x328   :  { %v220_v7 = vpop.f32.mrf.mxu3 }
 0x32a   :  { %v350_v12 = vpop.f32.mrf.mxu1 }
 0x330   :  { %v324_v9 = vpop.f32.mrf.mxu3 }
 0x331   :  { %615 = vrot.lane.b32.xlu0 %v324_v9, %s2579_s24 }
 0x338   :  { %v454_v11 = vpop.f32.mrf.mxu3 }
 0x339   :  { %623 = vrot.lane.b32.xlu0 %v454_v11, %s2582_s25 }
 0x340   :  { %v584_v13 = vpop.f32.mrf.mxu3 }
 0x341   :  { %617 = vrot.lane.b32.xlu0 %v350_v12, %s2579_s24  ;;  %631 = vrot.lane.b32.xlu1 %v584_v13, %s2016_s26  ;;  %v790_v13 = vld [vmem:[%s2573_s10 + $0x20] sm:$0xff] }
 0x34a   :  { %v480_v14 = vpop.f32.mrf.mxu1 }
 0x34b   :  { %625 = vrot.lane.b32.xlu1 %v480_v14, %s2582_s25 }
 0x352   :  { %v610_v15 = vpop.f32.mrf.mxu1 }
 0x353   :  { %633 = vrot.lane.b32.xlu0 %v610_v15, %s2016_s26  ;;  %v1881_v15 = vld [vmem:[%s2569_s6] ss:$0 sm:$0xff] }
 0x3a3   :  { %v616_v20 = vpop.permute.xlu0 %615 }
 0x3a4   :  { %v637_v22 = vsel %vm95_vm1, %v194_v6, %v616_v20  ;;  %v1882_v20 = vld [vmem:[%s2570_s7] ss:$0 sm:$0xff] }
 0x3ab   :  { %v624_v21 = vpop.permute.xlu0 %623 }
 0x3ac   :  { %v640_v23 = vsel %vm639_vm2, %v637_v22, %v624_v21 }
 0x3b3   :  { %v632_v24 = vpop.permute.xlu1 %631  ;;  %v618_v26 = vpop.permute.xlu0 %617 }
 0x3b4   :  { %v643_v25 = vsel %vm642_vm3, %v640_v23, %v632_v24  ;;  %v638_v29 = vsel %vm95_vm1, %v220_v7, %v618_v26  ;;  %v791_v7 = vld [vmem:[%s2573_s10 + $0x28] sm:$0xff] }
 0x3b5   :  { %1766 = vmatmul.msk.f32.vlgmr.msrb.gmra.mxu2 %vm60_vm0, %v643_v25  ;;  %815 = vmatpush.msrb.mxu3 %v791_v7 }
 0x3b7   :  { %816 = vmatpush.msrb.mxu3 %v790_v13 }
 0x3b9   :  { %817 = vmatpush.msrb.mxu3 %v789_v17 }
 0x3bd   :  { %v626_v28 = vpop.permute.xlu1 %625 }
 0x3be   :  { %v641_v30 = vsel %vm639_vm2, %v638_v29, %v626_v28 }
 0x3c5   :  { %v634_v32 = vpop.permute.xlu0 %633 }
 0x3c6   :  { %v644_v33 = vsel %vm642_vm3, %v641_v30, %v634_v32 }
 0x3c7   :  { %1767 = vmatmul.msk.f32.gmra.mxu2 %vm60_vm0, %v644_v33 }
 0x438   :  { %v676_v35 = vpop.f32.mrf.mxu2 }
 0x439   :  { %v677_v8 = vadd.f32 %v1880_v34, %v676_v35  ;;  %v788_v35 = vld [vmem:[%s2573_s10 + $0x10] sm:$0xff] }
 0x43a   :  { %818 = vmatpush.msrb.mxu3 %v788_v35  ;;  %v1887_v35 = vld [vmem:[%s2566_s3 + $0x1] ss:$0 sm:$0xff]  ;;  %s2584_s3 = smov 40  }
 0x43b   :  { %v682_v36 = vadd.f32 %v677_v8, %v2110_v4  ;;  %v787_v8 = vld [vmem:[%s2573_s10 + $0x8] sm:$0xff] }
 0x43c   :  { %819 = vmatpush.msrb.mxu3 %v787_v8 }
 0x43d   :  { %v686_v37 = vsel %vm60_vm0, %v682_v36, 0.0 }
 0x43e   :  { %687 = vadd.xlane.f32.xlu2 %v686_v37  ;;  %v1883_v37 = vld [vmem:[%s2572_s9] ss:$0 sm:$0xff] }
 0x44a   :  { %v679_v38 = vpop.f32.mrf.mxu2 }
 0x44b   :  { %v680_v39 = vadd.f32 %v1880_v34, %v679_v38 }
 0x44d   :  { %v683_v40 = vadd.f32 %v680_v39, %v2117_v5 }
 0x44f   :  { %v689_v41 = vsel %vm60_vm0, %v683_v40, 0.0 }
 0x450   :  { %690 = vadd.xlane.f32.xlu1 %v689_v41 }
 0x4b1   :  { %v688_v4 = vpop.xlane.xlu2 %687 }
 0x4b2   :  { %v699_v49 = vmul.f32 %v2271_v48, %v688_v4 }
 0x4b4   :  { %v701_v50 = vsub.f32 %v682_v36, %v699_v49  ;;  %v786_v36 = vld [vmem:[%s2573_s10] sm:$0xff] }
 0x4b5   :  { %820 = vmatpush.msrb.mxu3 %v786_v36 }
 0x4b6   :  { %v703_v10 = vmul.f32 %v701_v50, %v701_v50 }
 0x4b8   :  { %v705_v5 = vsel %vm60_vm0, %v703_v10, 0.0 }
 0x4b9   :  { %706 = vadd.xlane.f32.xlu0 %v705_v5 }
 0x4c3   :  { %v691_v51 = vpop.xlane.xlu1 %690 }
 0x4c4   :  { %v700_v52 = vmul.f32 %v2271_v48, %v691_v51 }
 0x4c6   :  { %v702_v53 = vsub.f32 %v683_v40, %v700_v52 }
 0x4c8   :  { %v704_v54 = vmul.f32 %v702_v53, %v702_v53 }
 0x4ca   :  { %v708_v55 = vsel %vm60_vm0, %v704_v54, 0.0 }
 0x4cb   :  { %709 = vadd.xlane.f32.xlu2 %v708_v55 }
 0x52c   :  { %v707_v61 = vpop.xlane.xlu0 %706 }
 0x52d   :  { %v711_v60 = vmul.f32 %v707_v61, %v2271_v48 }
 0x52f   :  { %v713_v62 = vadd.f32 1e-05, %v711_v60  ;;  %v1775_v60 = vld [vmem:[%s2565_s2 + $0x38] sm:$0xff] }
 0x530   :  { %914 = vmatpush.msra.mxu1 %v1775_v60 }
 0x531   :  { %1929 = vrsqrt.f32 %v713_v62  ;;  %vm721_vm6 = vweird.f32 %v713_v62 }
 0x537   :  { %v1930_v63 = vpop.eup %1929 }
 0x538   :  { %v716_v0 = vmul.f32 %v1930_v63, %v713_v62  ;;  %vm722_vm5 = vweird.f32 %v1930_v63  ;;  %v1774_v62 = vld [vmem:[%s2565_s2 + $0x30] sm:$0xff] }
 0x539   :  { %vm723_vm7 = vmor %vm721_vm6, %vm722_vm5  ;;  %915 = vmatpush.msra.mxu1 %v1774_v62 }
 0x53a   :  { %v717_v1 = vmul.f32 %v1930_v63, %v716_v0  ;;  %v1772_v0 = vld [vmem:[%s2565_s2 + $0x20] sm:$0xff] }
 0x53c   :  { %v718_v6 = vmul.f32 0.5, %v717_v1 }
 0x53e   :  { %v719_v9 = vsub.f32 1.5, %v718_v6  ;;  %v710_v11 = vpop.xlane.xlu2 %709 }
 0x53f   :  { %v712_v12 = vmul.f32 %v710_v11, %v2271_v48 }
 0x540   :  { %v720_v14 = vmul.f32 %v1930_v63, %v719_v9 }
 0x541   :  { %v714_v16 = vadd.f32 1e-05, %v712_v12 }
 0x542   :  { %v724_v18 = vsel %vm723_vm7, %v1930_v63, %v720_v14  ;;  %v1773_v63 = vld [vmem:[%s2565_s2 + $0x28] sm:$0xff] }
 0x543   :  { %v735_v19 = vmul.f32 %v724_v18, %v701_v50  ;;  %1931 = vrsqrt.f32 %v714_v16  ;;  %vm731_vm9 = vweird.f32 %v714_v16  ;;  %916 = vmatpush.msra.mxu1 %v1773_v63 }
 0x545   :  { %v740_v21 = vmul.f32 %v1881_v15, %v735_v19  ;;  %917 = vmatpush.msra.mxu1 %v1772_v0 }
 0x547   :  { %v745_v22 = vadd.f32 %v1882_v20, %v740_v21 }
 0x549   :  { %v1932_v23 = vpop.eup %1931  ;;  %1768 = vmatmul.msk.f32.vlgmr.msrb.gmra.mxu0 %vm60_vm0, %v745_v22 }
 0x54a   :  { %v726_v24 = vmul.f32 %v1932_v23, %v714_v16  ;;  %vm732_vm8 = vweird.f32 %v1932_v23  ;;  %v1885_v16 = vld [vmem:[%s2575_s12] ss:$0 sm:$0xff] }
 0x54b   :  { %vm733_vm10 = vmor %vm731_vm9, %vm732_vm8 }
 0x54c   :  { %v727_v25 = vmul.f32 %v1932_v23, %v726_v24 }
 0x54e   :  { %v728_v26 = vmul.f32 0.5, %v727_v25 }
 0x550   :  { %v729_v28 = vsub.f32 1.5, %v728_v26 }
 0x552   :  { %v730_v29 = vmul.f32 %v1932_v23, %v729_v28 }
 0x554   :  { %v734_v30 = vsel %vm733_vm10, %v1932_v23, %v730_v29 }
 0x555   :  { %v736_v32 = vmul.f32 %v734_v30, %v702_v53 }
 0x557   :  { %v741_v33 = vmul.f32 %v1881_v15, %v736_v32 }
 0x559   :  { %v746_v34 = vadd.f32 %v1882_v20, %v741_v33  ;;  %v1886_v20 = vld [vmem:[%s2576_s13] ss:$0 sm:$0xff] }
 0x55b   :  { %1769 = vmatmul.msk.f32.gmra.mxu0 %vm60_vm0, %v746_v34 }
 0x5c6   :  { %v778_v38 = vpop.f32.mrf.mxu0 }
 0x5c7   :  { %v779_v39 = vadd.f32 %v1883_v37, %v778_v38 }
 0x5c9   :  { %v784_v40 = vmax.f32 %v779_v39, 0.0 }
 0x5cb   :  { %1770 = vmatmul.msk.f32.vlgmr.msrb.gmra.mxu3 %vm798_vm11, %v784_v40 }
 0x5d8   :  { %v781_v41 = vpop.f32.mrf.mxu0 }
 0x5d9   :  { %v782_v42 = vadd.f32 %v1883_v37, %v781_v41 }
 0x5db   :  { %v785_v43 = vmax.f32 %v782_v42, 0.0 }
 0x5dd   :  { %1771 = vmatmul.msk.f32.gmra.mxu3 %vm798_vm11, %v785_v43 }
 0x64e   :  { %v822_v45 = vpop.f32.mrf.mxu3 }
 0x64f   :  { %v823_v46 = vadd.f32 %v1884_v44, %v822_v45 }
 0x651   :  { %v828_v47 = vadd.f32 %v823_v46, %v745_v22 }
 0x653   :  { %v832_v4 = vsel %vm60_vm0, %v828_v47, 0.0 }
 0x654   :  { %833 = vadd.xlane.f32.xlu2 %v832_v4 }
 0x660   :  { %v825_v49 = vpop.f32.mrf.mxu3 }
 0x661   :  { %v826_v50 = vadd.f32 %v1884_v44, %v825_v49 }
 0x663   :  { %v829_v10 = vadd.f32 %v826_v50, %v746_v34 }
 0x665   :  { %v835_v5 = vsel %vm60_vm0, %v829_v10, 0.0 }
 0x666   :  { %836 = vadd.xlane.f32.xlu2 %v835_v5 }
 0x6c7   :  { %v834_v51 = vpop.xlane.xlu2 %833 }
 0x6c8   :  { %v838_v52 = vmul.f32 %v834_v51, %v2271_v48 }
 0x6ca   :  { %v840_v53 = vsub.f32 %v828_v47, %v838_v52 }
 0x6cc   :  { %v842_v54 = vmul.f32 %v840_v53, %v840_v53 }
 0x6ce   :  { %v844_v55 = vsel %vm60_vm0, %v842_v54, 0.0 }
 0x6cf   :  { %845 = vadd.xlane.f32.xlu2 %v844_v55 }
 0x6d9   :  { %v837_v56 = vpop.xlane.xlu2 %836 }
 0x6da   :  { %v839_v57 = vmul.f32 %v837_v56, %v2271_v48 }
 0x6dc   :  { %v841_v58 = vsub.f32 %v829_v10, %v839_v57 }
 0x6de   :  { %v843_v59 = vmul.f32 %v841_v58, %v841_v58 }
 0x6e0   :  { %v847_v61 = vsel %vm60_vm0, %v843_v59, 0.0 }
 0x6e1   :  { %848 = vadd.xlane.f32.xlu2 %v847_v61 }
 0x742   :  { %v846_v1 = vpop.xlane.xlu2 %845 }
 0x743   :  { %v850_v2 = vmul.f32 %v846_v1, %v2271_v48 }
 0x745   :  { %v852_v3 = vadd.f32 1e-05, %v850_v2 }
 0x747   :  { %1933 = vrsqrt.f32 %v852_v3  ;;  %vm860_vm13 = vweird.f32 %v852_v3 }
 0x74d   :  { %v1934_v6 = vpop.eup %1933 }
 0x74e   :  { %v855_v7 = vmul.f32 %v1934_v6, %v852_v3  ;;  %vm861_vm12 = vweird.f32 %v1934_v6 }
 0x74f   :  { %vm862_vm14 = vmor %vm860_vm13, %vm861_vm12 }
 0x750   :  { %v856_v9 = vmul.f32 %v1934_v6, %v855_v7 }
 0x752   :  { %v857_v11 = vmul.f32 0.5, %v856_v9 }
 0x754   :  { %v858_v12 = vsub.f32 1.5, %v857_v11  ;;  %v849_v13 = vpop.xlane.xlu2 %848 }
 0x755   :  { %v851_v14 = vmul.f32 %v849_v13, %v2271_v48 }
 0x756   :  { %v859_v15 = vmul.f32 %v1934_v6, %v858_v12 }
 0x757   :  { %v853_v17 = vadd.f32 1e-05, %v851_v14 }
 0x758   :  { %v863_v18 = vsel %vm862_vm14, %v1934_v6, %v859_v15 }
 0x759   :  { %v874_v19 = vmul.f32 %v863_v18, %v840_v53  ;;  %1935 = vrsqrt.f32 %v853_v17  ;;  %vm870_vm4 = vweird.f32 %v853_v17 }
 0x75b   :  { %v879_v21 = vmul.f32 %v1885_v16, %v874_v19 }
 0x75d   :  { %v2357_v22 = vadd.f32 %v1886_v20, %v879_v21 }
 0x75f   :  { %v1936_v23 = vpop.eup %1935  ;;  %1777 = vmatmul.msk.f32.vlgmr.msra.gmra.mxu1 %vm60_vm0, %v2357_v22 }
 0x760   :  { %v865_v24 = vmul.f32 %v1936_v23, %v853_v17  ;;  %vm871_vm15 = vweird.f32 %v1936_v23 }
 0x761   :  { %vm872_vm5 = vmor %vm870_vm4, %vm871_vm15 }
 0x762   :  { %v866_v25 = vmul.f32 %v1936_v23, %v865_v24 }
 0x764   :  { %v867_v26 = vmul.f32 0.5, %v866_v25 }
 0x766   :  { %v868_v28 = vsub.f32 1.5, %v867_v26 }
 0x768   :  { %v869_v29 = vmul.f32 %v1936_v23, %v868_v28 }
 0x76a   :  { %v873_v30 = vsel %vm872_vm5, %v1936_v23, %v869_v29 }
 0x76b   :  { %v875_v32 = vmul.f32 %v873_v30, %v841_v58 }
 0x76d   :  { %v880_v33 = vmul.f32 %v1885_v16, %v875_v32 }
 0x76f   :  { %v2361_v34 = vadd.f32 %v1886_v20, %v880_v33 }
 0x771   :  { %1778 = vmatmul.msk.f32.gmra.mxu1 %vm60_vm0, %v2361_v34 }
 0x7dc   :  { %v919_v8 = vpop.f32.mrf.mxu1 }
 0x7dd   :  { %v920_v36 = vadd.f32 %v1887_v35, %v919_v8 }
 0x7df   :  { %928 = vrot.lane.b32.xlu1 %v920_v36, %s2004_s28  ;;  %v925_v41 = vmul.f32 0.35355338, %v920_v36 }
 0x7e7   :  { %1059 = vrot.lane.b32.xlu1 %v920_v36, %s2003_s27 }
 0x7ee   :  { %v922_v37 = vpop.f32.mrf.mxu1 }
 0x7ef   :  { %v923_v38 = vadd.f32 %v1887_v35, %v922_v37 }
 0x7f1   :  { %1087 = vrot.lane.b32.xlu2 %v923_v38, %s2003_s27  ;;  %956 = vrot.lane.b32.xlu0 %v923_v38, %s2004_s28  ;;  %v926_v39 = vmul.f32 0.35355338, %v923_v38  ;;  %v2372_v40 = vpack.i.bf16 %v923_v38, %v920_v36  ;;  %s2585_s27 = smov 56   ;;  %s2586_s28 = smov 8  }
 0x7f3   :  { %1215 = vrot.lane.b32.xlu1 %v926_v39, %s2008_s15 }
 0x7f9   :  { %1057 = vrot.lane.b32.xlu2 %v925_v41, %s2006_s29  ;;  %1085 = vrot.lane.b32.xlu0 %v926_v39, %s2006_s29  ;;  %s2018_s29 = smov [#allocation2]  }
 0x7fb   :  { %1347 = vrot.lane.b32.xlu1 %v923_v38, %s2007_s30 }
 0x801   :  { %1189 = vrot.lane.b32.xlu2 %v920_v36, %s2005_s0  ;;  %1217 = vrot.lane.b32.xlu0 %v923_v38, %s2005_s0  ;;  %s2587_s0 = smov 16  }
 0x803   :  { %1317 = vrot.lane.b32.xlu1 %v925_v41, %s2009_s16 }
 0x809   :  { %1345 = vrot.lane.b32.xlu2 %v926_v39, %s2009_s16  ;;  %1187 = vrot.lane.b32.xlu0 %v925_v41, %s2008_s15 }
 0x811   :  { %1319 = vrot.lane.b32.xlu0 %v920_v36, %s2007_s30  ;;  %s1726_s30 = sshll.u32 %s2018_s29, 4  ;;  %s1727_s30 = int_to_ptr.vmem [resolvable:$true] %s1726_s30 }
 0x84b   :  { %v1088_v42 = vpop.permute.xlu2 %1087 }
 0x84c   :  { %1787 = vmatpush.xpose.msk.msra.mxu3 %vm95_vm1, %v1088_v42 }
 0x851   :  { %v929_v43 = vpop.permute.xlu1 %928 }
 0x852   :  { %1779 = vmatpush.xpose.msk.msra.mxu2 %vm95_vm1, %v929_v43 }
 0x853   :  { %v1058_v44 = vpop.permute.xlu2 %1057 }
 0x855   :  { %1780 = vmatmul.msk.f32.vlgmr.msra.gmra.mxu2 %vm95_vm1, %v925_v41 }
 0x859   :  { %v1060_v45 = vpop.permute.xlu1 %1059 }
 0x85b   :  { %v1190_v47 = vpop.permute.xlu2 %1189 }
 0x863   :  { %v957_v46 = vpop.permute.xlu0 %956  ;;  %v1346_v51 = vpop.permute.xlu2 %1345 }
 0x864   :  { %1781 = vmatpush.xpose.msk.msra.mxu0 %vm95_vm1, %v957_v46 }
 0x865   :  { %v1216_v4 = vpop.permute.xlu1 %1215 }
 0x867   :  { %1782 = vmatmul.msk.f32.vlgmr.msra.gmra.mxu0 %vm95_vm1, %v926_v39 }
 0x868   :  { %1785 = vmatpush.xpose.msk.msrb.mxu0 %vm95_vm1, %v1060_v45 }
 0x86b   :  { %v1086_v49 = vpop.permute.xlu0 %1085 }
 0x86c   :  { %1791 = vmatpush.xpose.msk.msra.mxu0 %vm95_vm1, %v1190_v47  ;;  %1788 = vmatmul.msk.f32.vlgmr.msra.gmra.mxu3 %vm95_vm1, %v1086_v49 }
 0x86d   :  { %v1348_v10 = vpop.permute.xlu1 %1347 }
 0x86f   :  { %1786 = vmatmul.msk.f32.vlgmr.msrb.gmra.mxu0 %vm95_vm1, %v1058_v44 }
 0x873   :  { %v1218_v50 = vpop.permute.xlu0 %1217 }
 0x874   :  { %1793 = vmatpush.xpose.msk.msrb.mxu3 %vm95_vm1, %v1218_v50 }
 0x875   :  { %v1318_v53 = vpop.permute.xlu1 %1317 }
 0x877   :  { %1794 = vmatmul.msk.f32.vlgmr.msrb.gmra.mxu3 %vm95_vm1, %v1216_v4 }
 0x878   :  { %1799 = vmatpush.xpose.msk.msra.mxu3 %vm95_vm1, %v1348_v10 }
 0x87b   :  { %v1188_v5 = vpop.permute.xlu0 %1187 }
 0x87c   :  { %1792 = vmatmul.msk.f32.vlgmr.msra.gmra.mxu0 %vm95_vm1, %v1188_v5 }
 0x87f   :  { %1800 = vmatmul.msk.f32.vlgmr.msra.gmra.mxu3 %vm95_vm1, %v1346_v51 }
 0x883   :  { %v1320_v52 = vpop.permute.xlu0 %1319 }
 0x884   :  { %1797 = vmatpush.xpose.msk.msrb.mxu0 %vm95_vm1, %v1320_v52 }
 0x887   :  { %1798 = vmatmul.msk.f32.vlgmr.msrb.gmra.mxu0 %vm95_vm1, %v1318_v53 }
 0x8d8   :  { %v952_v54 = vpop.f32.mrf.mxu2 }
 0x8d9   :  { %v953_v55 = vadd.f32 %v952_v54, %v2171_v27 }
 0x8db   :  { %v983_v56 = vsel %vm95_vm1, %v953_v55, -inf }
 0x8dc   :  { %984 = vmax.xlane.f32.xlu2 %v983_v56 }
 0x8e4   :  { %v980_v57 = vpop.f32.mrf.mxu0 }
 0x8e5   :  { %v981_v58 = vadd.f32 %v980_v57, %v2178_v31 }
 0x8e7   :  { %v986_v59 = vsel %vm95_vm1, %v981_v58, -inf }
 0x8e8   :  { %987 = vmax.xlane.f32.xlu0 %v986_v59 }
 0x8ec   :  { %v1082_v61 = vpop.f32.mrf.mxu0 }
 0x8ed   :  { %v1083_v60 = vadd.f32 %v1082_v61, %v2171_v27 }
 0x8ef   :  { %v1110_v62 = vpop.f32.mrf.mxu3  ;;  %v1113_v63 = vsel %vm95_vm1, %v1083_v60, -inf }
 0x8f0   :  { %v1111_v0 = vadd.f32 %v1110_v62, %v2178_v31  ;;  %1114 = vmax.xlane.f32.xlu1 %v1113_v63 }
 0x8f2   :  { %v1116_v1 = vsel %vm95_vm1, %v1111_v0, -inf }
 0x8f3   :  { %1117 = vmax.xlane.f32.xlu2 %v1116_v1 }
 0x8f9   :  { %v1212_v2 = vpop.f32.mrf.mxu0 }
 0x8fa   :  { %v1213_v3 = vadd.f32 %v1212_v2, %v2171_v27  ;;  %v1240_v6 = vpop.f32.mrf.mxu3 }
 0x8fb   :  { %v1241_v7 = vadd.f32 %v1240_v6, %v2178_v31 }
 0x8fc   :  { %v1243_v9 = vsel %vm95_vm1, %v1213_v3, -inf }
 0x8fd   :  { %1244 = vmax.xlane.f32.xlu0 %v1243_v9  ;;  %v1246_v11 = vsel %vm95_vm1, %v1241_v7, -inf }
 0x8fe   :  { %1247 = vmax.xlane.f32.xlu1 %v1246_v11 }
 0x902   :  { %v1370_v12 = vpop.f32.mrf.mxu3 }
 0x903   :  { %v1371_v13 = vadd.f32 %v1370_v12, %v2178_v31 }
 0x904   :  { %v1342_v14 = vpop.f32.mrf.mxu0 }
 0x905   :  { %v1343_v15 = vadd.f32 %v1342_v14, %v2171_v27  ;;  %v1376_v16 = vsel %vm95_vm1, %v1371_v13, -inf }
 0x906   :  { %1377 = vmax.xlane.f32.xlu0 %v1376_v16 }
 0x907   :  { %v1373_v17 = vsel %vm95_vm1, %v1343_v15, -inf }
 0x908   :  { %1374 = vmax.xlane.f32.xlu2 %v1373_v17 }
 0x917   :  { %1860 = vrot.lane.b32.xlu1 %v2372_v40, %s2011_s21 }
 0x94f   :  { %v985_v18 = vpop.xlane.xlu2 %984 }
 0x950   :  { %v989_v19 = vsub.f32 %v953_v55, %v985_v18 }
 0x952   :  { %v991_v20 = vmul.f32 1.442695, %v989_v19 }
 0x954   :  { %1937 = vpow2.f32 %v991_v20 }
 0x95a   :  { %v2418_v21 = vpop.eup %1937 }
 0x95b   :  { %v988_v23 = vpop.xlane.xlu0 %987  ;;  %v995_v31 = vsel %vm95_vm1, %v2418_v21, 0.0 }
 0x95c   :  { %v990_v27 = vsub.f32 %v981_v58, %v988_v23  ;;  %996 = vadd.xlane.f32.xlu1 %v995_v31 }
 0x95e   :  { %v993_v24 = vmul.f32 1.442695, %v990_v27 }
 0x960   :  { %1939 = vpow2.f32 %v993_v24 }
 0x963   :  { %v1115_v25 = vpop.xlane.xlu1 %1114 }
 0x964   :  { %v1119_v26 = vsub.f32 %v1083_v60, %v1115_v25 }
 0x966   :  { %v1940_v28 = vpop.eup %1939  ;;  %v1121_v29 = vmul.f32 1.442695, %v1119_v26  ;;  %v1118_v30 = vpop.xlane.xlu2 %1117 }
 0x967   :  { %v1120_v32 = vsub.f32 %v1111_v0, %v1118_v30  ;;  %v998_v33 = vsel %vm95_vm1, %v1940_v28, 0.0 }
 0x968   :  { %1941 = vpow2.f32 %v1121_v29  ;;  %999 = vadd.xlane.f32.xlu2 %v998_v33 }
 0x969   :  { %v1123_v35 = vmul.f32 1.442695, %v1120_v32 }
 0x96b   :  { %1943 = vpow2.f32 %v1123_v35 }
 0x96e   :  { %v2423_v8 = vpop.eup %1941 }
 0x96f   :  { %v1125_v36 = vsel %vm95_vm1, %v2423_v8, 0.0 }
 0x970   :  { %1126 = vadd.xlane.f32.xlu0 %v1125_v36  ;;  %v1245_v38 = vpop.xlane.xlu0 %1244 }
 0x971   :  { %v1944_v37 = vpop.eup %1943  ;;  %v1248_v39 = vpop.xlane.xlu1 %1247  ;;  %v1249_v43 = vsub.f32 %v1213_v3, %v1245_v38 }
 0x972   :  { %v1250_v41 = vsub.f32 %v1241_v7, %v1248_v39  ;;  %v1128_v42 = vsel %vm95_vm1, %v1944_v37, 0.0 }
 0x973   :  { %1129 = vadd.xlane.f32.xlu2 %v1128_v42  ;;  %v1251_v45 = vmul.f32 1.442695, %v1249_v43  ;;  %v1806_v43 = vld [vmem:[%s2567_s4 + $0x38] sm:$0xff] }
 0x974   :  { %v1253_v44 = vmul.f32 1.442695, %v1250_v41  ;;  %1505 = vmatpush.msra.mxu0 %v1806_v43 }
 0x975   :  { %1870 = vrot.lane.b32.xlu1 %v2372_v40, %s2012_s22 }
 0x976   :  { %1945 = vpow2.f32 %v1253_v44  ;;  %v1805_v44 = vld [vmem:[%s2567_s4 + $0x30] sm:$0xff] }
 0x977   :  { %1947 = vpow2.f32 %v1251_v45  ;;  %v1804_v45 = vld [vmem:[%s2567_s4 + $0x28] sm:$0xff]  ;;  %1506 = vmatpush.msra.mxu0 %v1805_v44 }
 0x979   :  { %v1378_v10 = vpop.xlane.xlu0 %1377  ;;  %1507 = vmatpush.msra.mxu0 %v1804_v45 }
 0x97a   :  { %v1380_v51 = vsub.f32 %v1371_v13, %v1378_v10 }
 0x97b   :  { %v1375_v46 = vpop.xlane.xlu2 %1374 }
 0x97c   :  { %v2430_v47 = vpop.eup %1945  ;;  %v1379_v4 = vsub.f32 %v1343_v15, %v1375_v46  ;;  %v1383_v53 = vmul.f32 1.442695, %v1380_v51  ;;  %v1803_v46 = vld [vmem:[%s2567_s4 + $0x20] sm:$0xff] }
 0x97d   :  { %1875 = vrot.lane.b32.xlu1 %v2372_v40, %s2584_s3  ;;  %v1258_v49 = vsel %vm95_vm1, %v2430_v47, 0.0  ;;  %v1948_v5 = vpop.eup %1947  ;;  %1508 = vmatpush.msra.mxu0 %v1803_v46 }
 0x97e   :  { %1259 = vadd.xlane.f32.xlu0 %v1258_v49  ;;  %v1381_v50 = vmul.f32 1.442695, %v1379_v4  ;;  %v1255_v52 = vsel %vm95_vm1, %v1948_v5, 0.0 }
 0x980   :  { %1949 = vpow2.f32 %v1381_v50 }
 0x981   :  { %1951 = vpow2.f32 %v1383_v53 }
 0x986   :  { %1256 = vadd.xlane.f32.xlu0 %v1255_v52  ;;  %v1950_v55 = vpop.eup %1949 }
 0x987   :  { %v1385_v58 = vsel %vm95_vm1, %v1950_v55, 0.0  ;;  %v1952_v59 = vpop.eup %1951 }
 0x988   :  { %v1388_v61 = vsel %vm95_vm1, %v1952_v59, 0.0 }
 0x989   :  { %v1861_v54 = vpop.permute.xlu1 %1860 }
 0x98a   :  { %v1863_v56 = vunpack.i.h.bf16 %v1861_v54  ;;  %v1862_v57 = vunpack.i.l.bf16 %v1861_v54 }
 0x98b   :  { %1865 = vrot.lane.b32.xlu2 %v2372_v40, %s2585_s27 }
 0x98c   :  { %1026 = vmatpush.msrb.mxu1 %v1862_v57  ;;  %1052 = vmatpush.msrb.mxu2 %v1863_v56  ;;  %v1888_v57 = vld [vmem:[%s2568_s5 + $0x1] ss:$0 sm:$0xff] }
 0x98e   :  { %1386 = vadd.xlane.f32.xlu0 %v1385_v58 }
 0x996   :  { %1389 = vadd.xlane.f32.xlu0 %v1388_v61 }
 0x9cf   :  { %v997_v60 = vpop.xlane.xlu1 %996 }
 0x9d0   :  { %1953 = vrcp.f32 %v997_v60 }
 0x9d6   :  { %v1954_v62 = vpop.eup %1953 }
 0x9d7   :  { %v1003_v63 = vmul.f32 %v1954_v62, %v2418_v21 }
 0x9d9   :  { %1783 = vmatmul.msk.f32.vlgmr.msrb.gmra.mxu1 %vm95_vm1, %v1003_v63 }
 0x9db   :  { %v1000_v0 = vpop.xlane.xlu2 %999 }
 0x9dc   :  { %1955 = vrcp.f32 %v1000_v0 }
 0x9e2   :  { %v1956_v40 = vpop.eup %1955 }
 0x9e3   :  { %v1004_v1 = vmul.f32 %v1956_v40, %v1940_v28  ;;  %v1127_v2 = vpop.xlane.xlu0 %1126 }
 0x9e4   :  { %1957 = vrcp.f32 %v1127_v2 }
 0x9e5   :  { %1784 = vmatmul.msk.f32.vlgmr.msrb.gmra.mxu2 %vm95_vm1, %v1004_v1 }
 0x9e6   :  { %v1130_v3 = vpop.xlane.xlu2 %1129 }
 0x9e7   :  { %1959 = vrcp.f32 %v1130_v3  ;;  %v1871_v6 = vpop.permute.xlu1 %1870 }
 0x9e8   :  { %v1873_v19 = vunpack.i.h.bf16 %v1871_v6  ;;  %v1872_v20 = vunpack.i.l.bf16 %v1871_v6 }
 0x9ea   :  { %v1958_v7 = vpop.eup %1957 }
 0x9eb   :  { %v1133_v15 = vmul.f32 %v1958_v7, %v2423_v8 }
 0x9ed   :  { %v1960_v9 = vpop.eup %1959 }
 0x9ee   :  { %v1866_v11 = vpop.permute.xlu2 %1865  ;;  %v1134_v16 = vmul.f32 %v1960_v9, %v1944_v37 }
 0x9ef   :  { %v1868_v12 = vunpack.i.h.bf16 %v1866_v11  ;;  %v1867_v13 = vunpack.i.l.bf16 %v1866_v11  ;;  %v1876_v14 = vpop.permute.xlu1 %1875 }
 0x9f0   :  { %v1878_v17 = vunpack.i.h.bf16 %v1876_v14  ;;  %v1877_v18 = vunpack.i.l.bf16 %v1876_v14  ;;  %v1814_v14 = vld [vmem:[%s2571_s8 + $0x30] sm:$0xff] }
 0x9f1   :  { %1156 = vmatpush.msra.mxu1 %v1867_v13  ;;  %1182 = vmatpush.msra.mxu2 %v1868_v12  ;;  %v1260_v21 = vpop.xlane.xlu0 %1259 }
 0x9f2   :  { %1961 = vrcp.f32 %v1260_v21  ;;  %1789 = vmatmul.msk.f32.vlgmr.msra.gmra.mxu1 %vm95_vm1, %v1133_v15  ;;  %1790 = vmatmul.msk.f32.vlgmr.msra.gmra.mxu2 %vm95_vm1, %v1134_v16  ;;  %v1813_v15 = vld [vmem:[%s2571_s8 + $0x28] sm:$0xff]  ;;  %v1812_v16 = vld [vmem:[%s2571_s8 + $0x20] sm:$0xff]  ;;  %v1825_v21 = vld [vmem:[%s2573_s10 + $0x70] sm:$0xff] }
 0x9f3   :  { %1286 = vmatpush.msrb.mxu1 %v1872_v20  ;;  %1312 = vmatpush.msrb.mxu2 %v1873_v19  ;;  %v1826_v20 = vld [vmem:[%s2573_s10 + $0x78] sm:$0xff] }
 0x9f5   :  { %1416 = vmatpush.msra.mxu1 %v1877_v18  ;;  %1442 = vmatpush.msra.mxu2 %v1878_v17 }
 0x9f8   :  { %v1962_v23 = vpop.eup %1961 }
 0x9f9   :  { %v1264_v31 = vmul.f32 %v1962_v23, %v2430_v47  ;;  %v1257_v27 = vpop.xlane.xlu0 %1256  ;;  %v1824_v23 = vld [vmem:[%s2573_s10 + $0x68] sm:$0xff] }
 0x9fa   :  { %1963 = vrcp.f32 %v1257_v27 }
 0x9fb   :  { %1796 = vmatmul.msk.f32.vlgmr.msrb.gmra.mxu2 %vm95_vm1, %v1264_v31 }
 0xa00   :  { %v1964_v24 = vpop.eup %1963 }
 0xa01   :  { %v1263_v25 = vmul.f32 %v1964_v24, %v1948_v5  ;;  %v1387_v26 = vpop.xlane.xlu0 %1386  ;;  %v1823_v24 = vld [vmem:[%s2573_s10 + $0x60] sm:$0xff] }
 0xa02   :  { %1965 = vrcp.f32 %v1387_v26 }
 0xa03   :  { %1795 = vmatmul.msk.f32.vlgmr.msrb.gmra.mxu1 %vm95_vm1, %v1263_v25 }
 0xa04   :  { %1645 = vmatpush.msrb.mxu1 %v1826_v20 }
 0xa06   :  { %1646 = vmatpush.msrb.mxu1 %v1825_v21 }
 0xa08   :  { %v1966_v28 = vpop.eup %1965  ;;  %1647 = vmatpush.msrb.mxu1 %v1824_v23 }
 0xa09   :  { %v1393_v29 = vmul.f32 %v1966_v28, %v1950_v55  ;;  %v1390_v30 = vpop.xlane.xlu0 %1389 }
 0xa0a   :  { %1967 = vrcp.f32 %v1390_v30  ;;  %1648 = vmatpush.msrb.mxu1 %v1823_v24 }
 0xa0b   :  { %1801 = vmatmul.msk.f32.vlgmr.msra.gmra.mxu1 %vm95_vm1, %v1393_v29  ;;  %v1822_v29 = vld [vmem:[%s2573_s10 + $0x58] sm:$0xff] }
 0xa0c   :  { %1649 = vmatpush.msrb.mxu1 %v1822_v29  ;;  %v1893_v29 = vld [vmem:[%s2575_s12 + $0x1] ss:$0 sm:$0xff] }
 0xa10   :  { %v1968_v32 = vpop.eup %1967 }
 0xa11   :  { %v1394_v33 = vmul.f32 %v1968_v32, %v1952_v59 }
 0xa13   :  { %1802 = vmatmul.msk.f32.vlgmr.msra.gmra.mxu2 %vm95_vm1, %v1394_v33 }
 0xa56   :  { %v1028_v35 = vpop.f32.mrf.mxu1 }
 0xa68   :  { %v1054_v8 = vpop.f32.mrf.mxu2 }
 0xa6f   :  { %v1158_v36 = vpop.f32.mrf.mxu1 }
 0xa70   :  { %1449 = vrot.lane.b32.xlu2 %v1158_v36, %s2586_s28  ;;  %v1889_v36 = vld [vmem:[%s2569_s6 + $0x1] ss:$0 sm:$0xff] }
 0xa75   :  { %v1184_v37 = vpop.f32.mrf.mxu2 }
 0xa78   :  { %1451 = vrot.lane.b32.xlu2 %v1184_v37, %s2586_s28 }
 0xa7e   :  { %v1314_v41 = vpop.f32.mrf.mxu2 }
 0xa80   :  { %v1288_v38 = vpop.f32.mrf.mxu1 }
 0xa81   :  { %1457 = vrot.lane.b32.xlu0 %v1288_v38, %s2587_s0 }
 0xa88   :  { %v1418_v39 = vpop.f32.mrf.mxu1 }
 0xa89   :  { %1465 = vrot.lane.b32.xlu1 %v1418_v39, %s2016_s26 }
 0xa91   :  { %1459 = vrot.lane.b32.xlu1 %v1314_v41, %s2587_s0  ;;  %s1728_s0 = sshll.u32 %s2577_s14, 4  ;;  %s1729_s0 = int_to_ptr.hbm [resolvable:$true] %s1728_s0 }
 0xa96   :  { %v1444_v42 = vpop.f32.mrf.mxu2 }
 0xa97   :  { %1467 = vrot.lane.b32.xlu2 %v1444_v42, %s2016_s26  ;;  %v1890_v42 = vld [vmem:[%s2570_s7 + $0x1] ss:$0 sm:$0xff] }
 0xaca   :  { %v1450_v47 = vpop.permute.xlu2 %1449 }
 0xacb   :  { %v1471_v49 = vsel %vm95_vm1, %v1028_v35, %v1450_v47 }
 0xad2   :  { %v1452_v5 = vpop.permute.xlu2 %1451 }
 0xad3   :  { %v1472_v52 = vsel %vm95_vm1, %v1054_v8, %v1452_v5  ;;  %v1821_v5 = vld [vmem:[%s2573_s10 + $0x50] sm:$0xff] }
 0xad4   :  { %1650 = vmatpush.msrb.mxu1 %v1821_v5 }
 0xaf1   :  { %v1468_v54 = vpop.permute.xlu2 %1467 }
 0xaf3   :  { %v1458_v4 = vpop.permute.xlu0 %1457 }
 0xaf4   :  { %v1473_v50 = vsel %vm639_vm2, %v1471_v49, %v1458_v4 }
 0xafb   :  { %v1466_v10 = vpop.permute.xlu1 %1465 }
 0xafc   :  { %v1475_v51 = vsel %vm642_vm3, %v1473_v50, %v1466_v10 }
 0xafd   :  { %1808 = vmatmul.msk.f32.vlgmr.msra.gmra.mxu0 %vm60_vm0, %v1475_v51  ;;  %v1820_v51 = vld [vmem:[%s2573_s10 + $0x48] sm:$0xff] }
 0xafe   :  { %1651 = vmatpush.msrb.mxu1 %v1820_v51 }
 0xb03   :  { %v1460_v53 = vpop.permute.xlu1 %1459 }
 0xb04   :  { %v1474_v55 = vsel %vm639_vm2, %v1472_v52, %v1460_v53  ;;  %v1819_v52 = vld [vmem:[%s2573_s10 + $0x40] sm:$0xff] }
 0xb05   :  { %v1476_v56 = vsel %vm642_vm3, %v1474_v55, %v1468_v54  ;;  %1652 = vmatpush.msrb.mxu1 %v1819_v52  ;;  %v1891_v53 = vld [vmem:[%s2572_s9 + $0x1] ss:$0 sm:$0xff] }
 0xb06   :  { %1809 = vmatmul.msk.f32.gmra.mxu0 %vm60_vm0, %v1476_v56 }
 0xb7a   :  { %v1510_v58 = vpop.f32.mrf.mxu0 }
 0xb7b   :  { %v1511_v59 = vadd.f32 %v1888_v57, %v1510_v58 }
 0xb7d   :  { %v1516_v61 = vadd.f32 %v1511_v59, %v2357_v22 }
 0xb7f   :  { %v1522_v60 = vsel %vm60_vm0, %v1516_v61, 0.0 }
 0xb80   :  { %1523 = vadd.xlane.f32.xlu1 %v1522_v60 }
 0xb83   :  { %v1513_v62 = vpop.f32.mrf.mxu0 }
 0xb84   :  { %v1514_v63 = vadd.f32 %v1888_v57, %v1513_v62 }
 0xb86   :  { %v1517_v0 = vadd.f32 %v1514_v63, %v2361_v34  ;;  %v1815_v34 = vld [vmem:[%s2571_s8 + $0x38] sm:$0xff] }
 0xb87   :  { %1604 = vmatpush.msrb.mxu3 %v1815_v34 }
 0xb88   :  { %v1525_v40 = vsel %vm60_vm0, %v1517_v0, 0.0 }
 0xb89   :  { %1526 = vadd.xlane.f32.xlu0 %v1525_v40  ;;  %1605 = vmatpush.msrb.mxu3 %v1814_v14 }
 0xb8b   :  { %1606 = vmatpush.msrb.mxu3 %v1813_v15 }
 0xb8d   :  { %1607 = vmatpush.msrb.mxu3 %v1812_v16 }
 0xbf3   :  { %v1524_v1 = vpop.xlane.xlu1 %1523 }
 0xbf4   :  { %v1528_v2 = vmul.f32 %v1524_v1, %v2271_v48 }
 0xbf6   :  { %v1530_v3 = vsub.f32 %v1516_v61, %v1528_v2  ;;  %v1892_v61 = vld [vmem:[%s2574_s11 + $0x1] ss:$0 sm:$0xff] }
 0xbf8   :  { %v1532_v6 = vmul.f32 %v1530_v3, %v1530_v3 }
 0xbfa   :  { %v1534_v7 = vsel %vm60_vm0, %v1532_v6, 0.0 }
 0xbfb   :  { %1535 = vadd.xlane.f32.xlu2 %v1534_v7 }
 0xbfc   :  { %v1527_v9 = vpop.xlane.xlu0 %1526 }
 0xbfd   :  { %v1529_v22 = vmul.f32 %v1527_v9, %v2271_v48 }
 0xbff   :  { %v1531_v11 = vsub.f32 %v1517_v0, %v1529_v22 }
 0xc01   :  { %v1533_v12 = vmul.f32 %v1531_v11, %v1531_v11 }
 0xc03   :  { %v1537_v13 = vsel %vm60_vm0, %v1533_v12, 0.0 }
 0xc04   :  { %1538 = vadd.xlane.f32.xlu1 %v1537_v13 }
 0xc6e   :  { %v1536_v17 = vpop.xlane.xlu2 %1535 }
 0xc6f   :  { %v1540_v18 = vmul.f32 %v1536_v17, %v2271_v48 }
 0xc71   :  { %v1542_v19 = vadd.f32 1e-05, %v1540_v18 }
 0xc73   :  { %1969 = vrsqrt.f32 %v1542_v19  ;;  %vm1550_vm2 = vweird.f32 %v1542_v19 }
 0xc77   :  { %v1539_v31 = vpop.xlane.xlu1 %1538 }
 0xc78   :  { %v1541_v27 = vmul.f32 %v1539_v31, %v2271_v48 }
 0xc79   :  { %v1970_v25 = vpop.eup %1969 }
 0xc7a   :  { %v1545_v26 = vmul.f32 %v1970_v25, %v1542_v19  ;;  %v1543_v28 = vadd.f32 1e-05, %v1541_v27  ;;  %vm1551_vm1 = vweird.f32 %v1970_v25 }
 0xc7b   :  { %vm1552_vm3 = vmor %vm1550_vm2, %vm1551_vm1 }
 0xc7c   :  { %v1546_v30 = vmul.f32 %v1970_v25, %v1545_v26  ;;  %1971 = vrsqrt.f32 %v1543_v28  ;;  %vm1560_vm7 = vweird.f32 %v1543_v28 }
 0xc7e   :  { %v1547_v32 = vmul.f32 0.5, %v1546_v30 }
 0xc80   :  { %v1548_v33 = vsub.f32 1.5, %v1547_v32 }
 0xc82   :  { %v1972_v35 = vpop.eup %1971  ;;  %v1549_v8 = vmul.f32 %v1970_v25, %v1548_v33 }
 0xc83   :  { %v1555_v37 = vmul.f32 %v1972_v35, %v1543_v28  ;;  %vm1561_vm6 = vweird.f32 %v1972_v35 }
 0xc84   :  { %v1553_v38 = vsel %vm1552_vm3, %v1970_v25, %v1549_v8  ;;  %vm1562_vm8 = vmor %vm1560_vm7, %vm1561_vm6 }
 0xc85   :  { %v1564_v39 = vmul.f32 %v1553_v38, %v1530_v3  ;;  %v1556_v41 = vmul.f32 %v1972_v35, %v1555_v37 }
 0xc87   :  { %v1569_v43 = vmul.f32 %v1889_v36, %v1564_v39  ;;  %v1557_v44 = vmul.f32 0.5, %v1556_v41 }
 0xc89   :  { %v1558_v45 = vsub.f32 1.5, %v1557_v44  ;;  %v1574_v46 = vadd.f32 %v1890_v42, %v1569_v43 }
 0xc8b   :  { %v1559_v47 = vmul.f32 %v1972_v35, %v1558_v45  ;;  %1817 = vmatmul.msk.f32.vlgmr.msrb.gmra.mxu3 %vm60_vm0, %v1574_v46 }
 0xc8d   :  { %v1563_v4 = vsel %vm1562_vm8, %v1972_v35, %v1559_v47  ;;  %v1894_v35 = vld [vmem:[%s2576_s13 + $0x1] ss:$0 sm:$0xff]  ;;  %s2019_s13 = smov 128  }
 0xc8e   :  { %v1565_v49 = vmul.f32 %v1563_v4, %v1531_v11 }
 0xc90   :  { %v1570_v50 = vmul.f32 %v1889_v36, %v1565_v49 }
 0xc92   :  { %v1575_v10 = vadd.f32 %v1890_v42, %v1570_v50 }
 0xc94   :  { %1818 = vmatmul.msk.f32.gmra.mxu3 %vm60_vm0, %v1575_v10 }
 0xd0e   :  { %v1609_v54 = vpop.f32.mrf.mxu3 }
 0xd0f   :  { %v1610_v55 = vadd.f32 %v1891_v53, %v1609_v54 }
 0xd11   :  { %v1615_v56 = vmax.f32 %v1610_v55, 0.0 }
 0xd13   :  { %1828 = vmatmul.msk.f32.vlgmr.msrb.gmra.mxu1 %vm798_vm11, %v1615_v56 }
 0xd17   :  { %v1612_v57 = vpop.f32.mrf.mxu3 }
 0xd18   :  { %v1613_v58 = vadd.f32 %v1891_v53, %v1612_v57 }
 0xd1a   :  { %v1616_v59 = vmax.f32 %v1613_v58, 0.0 }
 0xd1c   :  { %1829 = vmatmul.msk.f32.gmra.mxu1 %vm798_vm11, %v1616_v59 }
 0xd90   :  { %v1654_v60 = vpop.f32.mrf.mxu1 }
 0xd91   :  { %v1655_v62 = vadd.f32 %v1892_v61, %v1654_v60 }
 0xd93   :  { %v1660_v63 = vadd.f32 %v1655_v62, %v1574_v46 }
 0xd95   :  { %v1666_v0 = vsel %vm60_vm0, %v1660_v63, 0.0 }
 0xd96   :  { %1667 = vadd.xlane.f32.xlu0 %v1666_v0 }
 0xd99   :  { %v1657_v40 = vpop.f32.mrf.mxu1 }
 0xd9a   :  { %v1658_v1 = vadd.f32 %v1892_v61, %v1657_v40 }
 0xd9c   :  { %v1661_v2 = vadd.f32 %v1658_v1, %v1575_v10 }
 0xd9e   :  { %v1669_v3 = vsel %vm60_vm0, %v1661_v2, 0.0 }
 0xd9f   :  { %1670 = vadd.xlane.f32.xlu2 %v1669_v3 }
 0xe09   :  { %v1668_v6 = vpop.xlane.xlu0 %1667 }
 0xe0a   :  { %v1672_v7 = vmul.f32 %v1668_v6, %v2271_v48 }
 0xe0c   :  { %v1674_v9 = vsub.f32 %v1660_v63, %v1672_v7 }
 0xe0e   :  { %v1676_v22 = vmul.f32 %v1674_v9, %v1674_v9 }
 0xe10   :  { %v1678_v11 = vsel %vm60_vm0, %v1676_v22, 0.0 }
 0xe11   :  { %1679 = vadd.xlane.f32.xlu1 %v1678_v11 }
 0xe12   :  { %v1671_v12 = vpop.xlane.xlu2 %1670 }
 0xe13   :  { %v1673_v13 = vmul.f32 %v1671_v12, %v2271_v48 }
 0xe15   :  { %v1675_v34 = vsub.f32 %v1661_v2, %v1673_v13 }
 0xe17   :  { %v1677_v14 = vmul.f32 %v1675_v34, %v1675_v34 }
 0xe19   :  { %v1681_v15 = vsel %vm60_vm0, %v1677_v14, 0.0 }
 0xe1a   :  { %1682 = vadd.xlane.f32.xlu0 %v1681_v15 }
 0xe84   :  { %v1680_v16 = vpop.xlane.xlu1 %1679 }
 0xe85   :  { %v1684_v17 = vmul.f32 %v1680_v16, %v2271_v48 }
 0xe87   :  { %v1686_v18 = vadd.f32 1e-05, %v1684_v17 }
 0xe89   :  { %1973 = vrsqrt.f32 %v1686_v18  ;;  %vm1694_vm10 = vweird.f32 %v1686_v18 }
 0xe8d   :  { %v1683_v19 = vpop.xlane.xlu0 %1682 }
 0xe8e   :  { %v1685_v20 = vmul.f32 %v1683_v19, %v2271_v48 }
 0xe8f   :  { %v1974_v21 = vpop.eup %1973 }
 0xe90   :  { %v1689_v23 = vmul.f32 %v1974_v21, %v1686_v18  ;;  %v1687_v31 = vadd.f32 1e-05, %v1685_v20  ;;  %vm1695_vm9 = vweird.f32 %v1974_v21 }
 0xe91   :  { %vm1696_vm11 = vmor %vm1694_vm10, %vm1695_vm9 }
 0xe92   :  { %v1690_v27 = vmul.f32 %v1974_v21, %v1689_v23  ;;  %1975 = vrsqrt.f32 %v1687_v31  ;;  %vm1704_vm13 = vweird.f32 %v1687_v31 }
 0xe94   :  { %v1691_v24 = vmul.f32 0.5, %v1690_v27 }
 0xe96   :  { %v1692_v25 = vsub.f32 1.5, %v1691_v24 }
 0xe98   :  { %v1976_v26 = vpop.eup %1975  ;;  %v1693_v28 = vmul.f32 %v1974_v21, %v1692_v25 }
 0xe99   :  { %v1699_v30 = vmul.f32 %v1976_v26, %v1687_v31  ;;  %vm1705_vm12 = vweird.f32 %v1976_v26 }
 0xe9a   :  { %v1697_v32 = vsel %vm1696_vm11, %v1974_v21, %v1693_v28  ;;  %vm1706_vm14 = vmor %vm1704_vm13, %vm1705_vm12 }
 0xe9b   :  { %v1708_v33 = vmul.f32 %v1697_v32, %v1674_v9  ;;  %v1700_v48 = vmul.f32 %v1976_v26, %v1699_v30 }
 0xe9d   :  { %v1713_v8 = vmul.f32 %v1893_v29, %v1708_v33  ;;  %v1701_v36 = vmul.f32 0.5, %v1700_v48 }
 0xe9f   :  { %v1702_v37 = vsub.f32 1.5, %v1701_v36  ;;  %v1718_v38 = vadd.f32 %v1894_v35, %v1713_v8 }
 0xea1   :  { %v1703_v39 = vmul.f32 %v1976_v26, %v1702_v37  ;;  %1720 = vst.msk [vmem:[#allocation2] sm:$0xff] %vm60_vm0, %v1718_v38 }
 0xea3   :  { %v1707_v41 = vsel %vm1706_vm14, %v1976_v26, %v1703_v39 }
 0xea4   :  { %v1709_v42 = vmul.f32 %v1707_v41, %v1675_v34 }
 0xea6   :  { %v1714_v43 = vmul.f32 %v1893_v29, %v1709_v42 }
 0xea8   :  { %v1719_v44 = vadd.f32 %v1894_v35, %v1714_v43 }
 0xeaa   :  { %1721 = vst.msk [vmem:[#allocation2 + $0x8] sm:$0xff] %vm60_vm0, %v1719_v44 }
 0xeab   :  { %1734 = dma.vmem_to_hbm [thread:$0]  %s1727_s30, 256, %s1729_s0, [#allocation3], %s2019_s13, %s2019_s13, %s2586_s28  }
 0xeac   :  { %2001 = dma.done.wait [#allocation3], 256  }
 0xead   :  { %2002 = vsyncadd [#allocation3], 4294967040 }
 0xeae   :  { %1739 = vsyncpa [#allocation3], 1 }

</bundles_post_ra>
